<compile_context>
chip_gen: v7x
topology: tpu7x:2x2x1
jax: 0.10.0
libtpu: 0.0.40
codegen_flags: <defaults>
</compile_context>

<pallas_src>
import jax
import jax.numpy as jnp
from jax.experimental import pallas as pl
from jax.experimental.pallas import tpu as pltpu


def _round_up(v, m):
    return ((v + m - 1) // m) * m


# ----------------------------------------------------------------------------
# kernel 1: per-node features   xw = relu(x @ Wt + bt) @ Wg      (row-parallel)
# ----------------------------------------------------------------------------
def _node_feature_kernel(x_ref, wt_ref, bt_ref, wg_ref, xw_ref):
    h0 = jnp.dot(x_ref[...], wt_ref[...], preferred_element_type=jnp.float32)
    h0 = jnp.maximum(h0 + bt_ref[...], 0.0).astype(jnp.bfloat16)
    xw = jnp.dot(h0, wg_ref[...], preferred_element_type=jnp.float32)
    xw_ref[...] = xw.astype(jnp.bfloat16)


# ----------------------------------------------------------------------------
# kernel 2: tiled A_hat contraction + pooled/root reductions + folded co-att
#           epilogue.  grid = (row-blocks i, K-blocks k), reduction axis last.
# ----------------------------------------------------------------------------
def _graph_reduce_kernel(a_ref, xw_ref, membt_ref, aroot_ref, bg_ref, invc_ref,
                         w1_ref, b1_ref, w2_ref, b2_ref, out_ref,
                         x2_acc, pooled_acc, roots_acc):
    i = pl.program_id(0)
    k = pl.program_id(1)
    ni = pl.num_programs(0)
    nk = pl.num_programs(1)

    @pl.when(jnp.logical_and(i == 0, k == 0))
    def _():
        pooled_acc[...] = jnp.zeros_like(pooled_acc)
        roots_acc[...] = jnp.zeros_like(roots_acc)

    @pl.when(k == 0)
    def _():
        x2_acc[...] = jnp.zeros_like(x2_acc)

    # partial x2 = A_hat[i-block, k-block] @ xw[k-block]  (bf16 MXU, f32 acc)
    x2_acc[...] += jnp.dot(a_ref[...], xw_ref[...],
                           preferred_element_type=jnp.float32)

    # roots = A_hat[rootindex, :] @ xw   (accumulated once, on the first row pass)
    @pl.when(i == 0)
    def _():
        roots_acc[...] += jnp.dot(aroot_ref[...], xw_ref[...],
                                  preferred_element_type=jnp.float32)

    # finalize this row block: relu + pooled (un-normalized) graph sums in bf16
    @pl.when(k == nk - 1)
    def _():
        x2_blk = x2_acc[...] + bg_ref[...]
        xr_blk = jnp.maximum(x2_blk, 0.0).astype(jnp.bfloat16)
        pooled_acc[...] += jnp.dot(membt_ref[...], xr_blk,
                                   preferred_element_type=jnp.float32)

    # epilogue: 1/counts in f32, folded value+output projections, one 256-lane store
    @pl.when(jnp.logical_and(i == ni - 1, k == nk - 1))
    def _():
        pooled = (pooled_acc[...] * invc_ref[...]).astype(jnp.bfloat16)
        roots = (roots_acc[...] + bg_ref[...]).astype(jnp.bfloat16)
        o1 = jnp.dot(pooled, w1_ref[...],
                     preferred_element_type=jnp.float32) + b1_ref[...]
        o2 = jnp.dot(roots, w2_ref[...],
                     preferred_element_type=jnp.float32) + b2_ref[...]
        out_ref[...] = jnp.concatenate([o1, o2], axis=1)


# ----------------------------------------------------------------------------
# FE_GCN forward (glue: graph normalization, selection matrices, pallas_calls)
# ----------------------------------------------------------------------------
def fe_gcn_forward(x, edge_index, batch, rootindex, fp, *, tile=128):
    n, text_in = x.shape
    b = int(rootindex.shape[0])
    bp = _round_up(b, 8)
    vp = fp["wt"].shape[1]
    h = fp["wg"].shape[1]
    np_ = _round_up(n, tile)
    n_blk = np_ // tile

    # ---- GCN normalized adjacency:  A_hat = D^-1/2 (A + I) D^-1/2 ----
    # TODO(synk): for very large graphs (esp. v5e), build A_hat row blocks
    # in-kernel from a scalar-prefetched CSR edge list instead of a dense matrix.
    src, dst = edge_index[0], edge_index[1]
    adj = (jnp.zeros((n, n), jnp.float32).at[dst, src].add(1.0)
           + jnp.eye(n, dtype=jnp.float32))
    deg = adj.sum(axis=1)
    dinv = 1.0 / jnp.sqrt(deg)
    a_hat = adj * dinv[:, None] * dinv[None, :]

    a_hat_p = jnp.zeros((np_, np_), jnp.float32).at[:n, :n].set(a_hat)
    a_root = jnp.zeros((bp, np_), jnp.float32).at[:b, :].set(a_hat_p[rootindex, :])

    # pooling: 0/1 membership (bf16-exact) + separate f32 1/counts scale
    memb = jax.nn.one_hot(batch, bp, dtype=jnp.float32)             # [n, bp]
    counts = jnp.maximum(memb.sum(axis=0), 1.0)
    inv_counts = (1.0 / counts)[:, None]                            # [bp, 1] f32
    memb_t = jnp.zeros((bp, np_), jnp.float32).at[:, :n].set(memb.T)

    x_p = jnp.zeros((np_, text_in), jnp.bfloat16).at[:n, :].set(
        x.astype(jnp.bfloat16))

    # ---- kernel 1: xw = relu(text_fc(x)) @ Wg, parallel over node row blocks ----
    xw = pl.pallas_call(
        _node_feature_kernel,
        out_shape=jax.ShapeDtypeStruct((np_, h), jnp.bfloat16),
        grid=(n_blk,),
        in_specs=[pl.BlockSpec((tile, text_in), lambda i: (i, 0)),
                  pl.BlockSpec((text_in, vp), lambda i: (0, 0)),
                  pl.BlockSpec((1, vp), lambda i: (0, 0)),
                  pl.BlockSpec((vp, h), lambda i: (0, 0))],
        out_specs=pl.BlockSpec((tile, h), lambda i: (i, 0)),
        compiler_params=pltpu.CompilerParams(
            dimension_semantics=("parallel",)),
    )(x_p, fp["wt"], fp["bt"], fp["wg"])

    # ---- kernel 2: streamed A_hat tiles, reductions, folded co-att epilogue ----
    out = pl.pallas_call(
        _graph_reduce_kernel,
        out_shape=jax.ShapeDtypeStruct((bp, 2 * h), jnp.float32),
        grid=(n_blk, n_blk),
        in_specs=[pl.BlockSpec((tile, tile), lambda i, k: (i, k)),   # A_hat
                  pl.BlockSpec((tile, h), lambda i, k: (k, 0)),      # xw
                  pl.BlockSpec((bp, tile), lambda i, k: (0, i)),     # memb^T
                  pl.BlockSpec((bp, tile), lambda i, k: (0, k)),     # A_hat[root]
                  pl.BlockSpec((1, h), lambda i, k: (0, 0)),         # bg
                  pl.BlockSpec((bp, 1), lambda i, k: (0, 0)),        # 1/counts
                  pl.BlockSpec((h, h), lambda i, k: (0, 0)),         # W1'
                  pl.BlockSpec((1, h), lambda i, k: (0, 0)),         # b1'
                  pl.BlockSpec((h, h), lambda i, k: (0, 0)),         # W2'
                  pl.BlockSpec((1, h), lambda i, k: (0, 0))],        # b2'
        out_specs=pl.BlockSpec((bp, 2 * h), lambda i, k: (0, 0)),
        scratch_shapes=[pltpu.VMEM((tile, h), jnp.float32),          # x2 block acc
                        pltpu.VMEM((bp, h), jnp.float32),            # pooled acc
                        pltpu.VMEM((bp, h), jnp.float32)],           # roots acc
        compiler_params=pltpu.CompilerParams(
            dimension_semantics=("arbitrary", "arbitrary"),
            vmem_limit_bytes=32 * 1024 * 1024),
    )(a_hat_p.astype(jnp.bfloat16), xw,
      memb_t.astype(jnp.bfloat16), a_root.astype(jnp.bfloat16),
      fp["bg"], inv_counts,
      fp["w1"], fp["b1"], fp["w2"], fp["b2"])

    # drop the padded graph rows (padded rows contain b1/b2 by construction)
    return out[:b]


# ----------------------------------------------------------------------------
# deterministic parameter construction (synthetic; no checkpoint loading)
# ----------------------------------------------------------------------------
def make_params(key, text_in, vector_size, hid_feats, out_feats):
    assert hid_feats == out_feats, "co_att hidden_size == out_feats requires hid==out"
    keys = jax.random.split(key, 6)

    def lin(k, fan_in, fan_out):
        kw, kb = jax.random.split(k)
        lim = 1.0 / (fan_in ** 0.5)
        w = jax.random.uniform(kw, (fan_in, fan_out), jnp.float32, -lim, lim)
        bb = jax.random.uniform(kb, (1, fan_out), jnp.float32, -lim, lim)
        return w, bb

    p = {}
    p["w_text"], p["b_text"] = lin(keys[0], text_in, vector_size)
    p["w_gcn"], p["b_gcn"] = lin(keys[1], vector_size, hid_feats)
    # co-attention: q/k projections are dead (length-1 key axis -> softmax == 1);
    # only the value and output projections affect the forward output.
    p["wv1"], p["bv1"] = lin(keys[2], out_feats, out_feats)
    p["wv2"], p["bv2"] = lin(keys[3], out_feats, out_feats)
    p["wo1"], p["bo1"] = lin(keys[4], out_feats, out_feats)
    p["wo2"], p["bo2"] = lin(keys[5], out_feats, out_feats)
    return p


def fuse_for_kernel(p):
    """Offline prep: lane-dense padding, value@output folding, bf16 cast."""
    v = p["w_text"].shape[1]
    vp = _round_up(v, 128)
    h = p["w_gcn"].shape[1]

    wt = jnp.zeros((p["w_text"].shape[0], vp), jnp.float32).at[:, :v].set(p["w_text"])
    bt = jnp.zeros((1, vp), jnp.float32).at[:, :v].set(p["b_text"])
    wg = jnp.zeros((vp, h), jnp.float32).at[:v, :].set(p["w_gcn"])

    w1 = p["wv1"] @ p["wo1"]
    b1 = p["bv1"] @ p["wo1"] + p["bo1"]
    w2 = p["wv2"] @ p["wo2"]
    b2 = p["bv2"] @ p["wo2"] + p["bo2"]

    return dict(
        wt=wt.astype(jnp.bfloat16), bt=bt,
        wg=wg.astype(jnp.bfloat16), bg=p["b_gcn"],
        w1=w1.astype(jnp.bfloat16), b1=b1,
        w2=w2.astype(jnp.bfloat16), b2=b2,
    )


# ----------------------------------------------------------------------------
# pure-JAX f32 reference (faithful to the PyTorch module, eval mode)
# ----------------------------------------------------------------------------
def fe_gcn_reference(x, edge_index, batch, rootindex, p):
    n = x.shape[0]
    src, dst = edge_index[0], edge_index[1]
    adj = (jnp.zeros((n, n), jnp.float32).at[dst, src].add(1.0)
           + jnp.eye(n, dtype=jnp.float32))
    deg = adj.sum(axis=1)
    dinv = 1.0 / jnp.sqrt(deg)
    a_hat = adj * dinv[:, None] * dinv[None, :]

    h0 = jnp.maximum(x @ p["w_text"] + p["b_text"], 0.0)
    x2 = a_hat @ (h0 @ p["w_gcn"]) + p["b_gcn"]
    xr = jnp.maximum(x2, 0.0)
    r = x2[rootindex[batch]]
    # co-attention with sequence length 1: attention probs are exactly 1
    o1 = (xr @ p["wv1"] + p["bv1"]) @ p["wo1"] + p["bo1"]
    o2 = (r @ p["wv2"] + p["bv2"]) @ p["wo2"] + p["bo2"]
    cat = jnp.concatenate([o1, o2], axis=1)
    nb = int(rootindex.shape[0])
    memb = jax.nn.one_hot(batch, nb, dtype=jnp.float32)
    counts = memb.sum(axis=0)
    return (memb / counts[None, :]).T @ cat


# ----------------------------------------------------------------------------
if __name__ == "__main__":
    # small, deterministic problem:
    #   2 graphs x 96 nodes = 192 nodes (padded to 256 -> 2x2 tile grid),
    #   raw node features of dim 1280, vector_size = 64 (padded to 128),
    #   hid = out = 128.
    TEXT_IN = 1280
    VECTOR_SIZE = 64
    HID_FEATS = 128
    OUT_FEATS = 128
    NODES_PER_GRAPH = 96
    NUM_GRAPHS = 2
    N = NODES_PER_GRAPH * NUM_GRAPHS

    key = jax.random.PRNGKey(0)
    kx, kp = jax.random.split(key)

    x = jax.random.normal(kx, (N, TEXT_IN), jnp.float32)

    # star graph per sample: root -> each child (PyG edge_index[0]=src, [1]=dst)
    src_list, dst_list = [], []
    for g in range(NUM_GRAPHS):
        base = g * NODES_PER_GRAPH
        for c in range(1, NODES_PER_GRAPH):
            src_list.append(base)
            dst_list.append(base + c)
    edge_index = jnp.array([src_list, dst_list], dtype=jnp.int32)

    batch = jnp.repeat(jnp.arange(NUM_GRAPHS, dtype=jnp.int32), NODES_PER_GRAPH)
    rootindex = jnp.array([g * NODES_PER_GRAPH for g in range(NUM_GRAPHS)],
                          dtype=jnp.int32)

    # TODO(synk): Dropout layers (drop / dropout1 / dropout2 / dropout3) are
    # identity in eval mode and are intentionally omitted.
    params = make_params(kp, TEXT_IN, VECTOR_SIZE, HID_FEATS, OUT_FEATS)
    fused = fuse_for_kernel(params)

    out = fe_gcn_forward(x, edge_index, batch, rootindex, fused)
    out = jax.block_until_ready(out)

    assert out.shape == (NUM_GRAPHS, 2 * OUT_FEATS)
    assert bool(jnp.all(jnp.isfinite(out)))

    ref = fe_gcn_reference(x, edge_index, batch, rootindex, params)
    assert bool(jnp.allclose(out, ref, rtol=5e-2, atol=5e-2))

    print("KERNEL_OK")
</pallas_src>

<mosaic_0001>
module attributes {stable_mosaic.version = 11 : i64} {
  func.func @_node_feature_kernel(%arg0: i32, %arg1: memref<128x1280xbf16, #tpu.memory_space<vmem>>, %arg2: memref<1280x128xbf16, #tpu.memory_space<vmem>>, %arg3: memref<1x128xf32, #tpu.memory_space<vmem>>, %arg4: memref<128x128xbf16, #tpu.memory_space<vmem>>, %arg5: memref<128x128xbf16, #tpu.memory_space<vmem>>) attributes {dimension_semantics = [#tpu.dimension_semantics<parallel>], iteration_bounds = array<i64: 2>, scalar_prefetch = 0 : i64, scratch_operands = 0 : i64, tpu.core_type = #tpu.core_type<tc>, window_params = [{transform_indices = @transform_0, window_bounds = array<i64: 128, 1280>}, {pipeline_mode = #tpu.pipeline_mode<synchronous>, transform_indices = @transform_1, window_bounds = array<i64: 1280, 128>}, {pipeline_mode = #tpu.pipeline_mode<synchronous>, transform_indices = @transform_2, window_bounds = array<i64: 1, 128>}, {pipeline_mode = #tpu.pipeline_mode<synchronous>, transform_indices = @transform_3, window_bounds = array<i64: 128, 128>}, {transform_indices = @transform_4, window_bounds = array<i64: 128, 128>}]} {
    %c0 = arith.constant 0 : index
    %c0_0 = arith.constant 0 : index
    %0 = vector.load %arg1[%c0, %c0_0] : memref<128x1280xbf16, #tpu.memory_space<vmem>>, vector<128x1280xbf16>
    %c0_1 = arith.constant 0 : index
    %c0_2 = arith.constant 0 : index
    %1 = vector.load %arg2[%c0_1, %c0_2] : memref<1280x128xbf16, #tpu.memory_space<vmem>>, vector<1280x128xbf16>
    %cst = arith.constant dense<0.000000e+00> : vector<128x128xf32>
    %2 = tpu.matmul %0, %1, %cst {dimension_numbers = #tpu.dot_dimension_numbers<[1], [0], [0], [1], [0, 0, 1, 1], [], []>} : vector<128x1280xbf16>, vector<1280x128xbf16>, vector<128x128xf32> -> vector<128x128xf32>
    %c0_3 = arith.constant 0 : index
    %c0_4 = arith.constant 0 : index
    %3 = vector.load %arg3[%c0_3, %c0_4] : memref<1x128xf32, #tpu.memory_space<vmem>>, vector<1x128xf32>
    %4 = vector.broadcast %3 : vector<1x128xf32> to vector<128x128xf32>
    %5 = arith.addf %2, %4 : vector<128x128xf32>
    %cst_5 = arith.constant 0.000000e+00 : f32
    %6 = vector.broadcast %cst_5 : f32 to vector<128x128xf32>
    %7 = arith.maximumf %5, %6 : vector<128x128xf32>
    %8 = arith.truncf %7 : vector<128x128xf32> to vector<128x128xbf16>
    %c0_6 = arith.constant 0 : index
    %c0_7 = arith.constant 0 : index
    %9 = vector.load %arg4[%c0_6, %c0_7] : memref<128x128xbf16, #tpu.memory_space<vmem>>, vector<128x128xbf16>
    %cst_8 = arith.constant dense<0.000000e+00> : vector<128x128xf32>
    %10 = tpu.matmul %8, %9, %cst_8 {dimension_numbers = #tpu.dot_dimension_numbers<[1], [0], [0], [1], [0, 0, 1, 1], [], []>} : vector<128x128xbf16>, vector<128x128xbf16>, vector<128x128xf32> -> vector<128x128xf32>
    %11 = arith.truncf %10 : vector<128x128xf32> to vector<128x128xbf16>
    %c0_9 = arith.constant 0 : index
    %c0_10 = arith.constant 0 : index
    %12 = vector.load %arg5[%c0_9, %c0_10] : memref<128x128xbf16, #tpu.memory_space<vmem>>, vector<128x128xbf16>
    tpu.vector_store %arg5[%c0_9, %c0_10], %11 {strides = array<i32>} : memref<128x128xbf16, #tpu.memory_space<vmem>>, vector<128x128xbf16>,
    return
  }
  func.func @transform_0(%arg0: i32) -> (i32, i32) {
    %c0_i32 = arith.constant 0 : i32
    %c0_i32_0 = arith.constant 0 : i32
    return %arg0, %c0_i32 : i32, i32
  }
  func.func @transform_1(%arg0: i32) -> (i32, i32) {
    %c0_i32 = arith.constant 0 : i32
    %c0_i32_0 = arith.constant 0 : i32
    %c0_i32_1 = arith.constant 0 : i32
    return %c0_i32, %c0_i32_0 : i32, i32
  }
  func.func @transform_2(%arg0: i32) -> (i32, i32) {
    %c0_i32 = arith.constant 0 : i32
    %c0_i32_0 = arith.constant 0 : i32
    %c0_i32_1 = arith.constant 0 : i32
    return %c0_i32, %c0_i32_0 : i32, i32
  }
  func.func @transform_3(%arg0: i32) -> (i32, i32) {
    %c0_i32 = arith.constant 0 : i32
    %c0_i32_0 = arith.constant 0 : i32
    %c0_i32_1 = arith.constant 0 : i32
    return %c0_i32, %c0_i32_0 : i32, i32
  }
  func.func @transform_4(%arg0: i32) -> (i32, i32) {
    %c0_i32 = arith.constant 0 : i32
    %c0_i32_0 = arith.constant 0 : i32
    return %arg0, %c0_i32 : i32, i32
  }
}

</mosaic_0001>

<bundles_post_ra>
// kernel: tpu_custom_call.1
= control target key start
LH: loop header
LB: loop body
LE: loop exit
PB: predicated region body
PF: predicated region fallthrough
CT: control target
= control target key end

     0   :  { %9 = vsyncpa [#allocation3], 0  ;;  %s3777_s0 = inlined_call_operand.hbm [shape: bf16[256,1280], index: 0, kind: input, shape index: {}]   ;;  %s3778_s1 = inlined_call_operand.hbm [shape: bf16[1280,128], index: 1, kind: input, shape index: {}]   ;;  %s3779_s2 = inlined_call_operand.vmem [shape: f32[1,128], index: 2, kind: input, shape index: {}]   ;;  %s3780_s3 = inlined_call_operand.hbm [shape: bf16[128,128], index: 3, kind: input, shape index: {}]   ;;  %s3781_s4 = inlined_call_operand.hbm [shape: bf16[256,128], index: 4, kind: output, shape index: {}]  }
   0x1   :  { %11 = vsyncpa [#allocation3 + $0x1], 0 }
   0x2   :  { %12 = vsyncpa [#allocation6], 0 }
   0x3   :  { %13 = vsyncpa [#allocation4], 0 }
   0x4   :  { %15 = vsyncpa [#allocation4 + $0x1], 0  ;;  %s3343_s15 = smov 0   ;;  %s3345_s16 = smov 0  }
   0x5   :  { %s3347_s17 = smov 0   ;;  %s3349_s18 = smov 0  }
   0x6 LB: > { %s3364_s19 = sadd.s32 4294967295, %s3306_s18   ;;  %s2232_s20 = sadd.s32 4294967294, %s3306_s18   ;;  %s3306_s18 = sphi %s3349_s18, %s3801_s18   ;;  %s3302_s17 = sphi %s3347_s17, %s3800_s17   ;;  %s3298_s16 = sphi %s3345_s16, %s3799_s16   ;;  %s3294_s15 = sphi %s3343_s15, %s3798_s15  }
   0x7   : > { %p41_p0 = scmp.ne.s32.totalorder %s3298_s16, %s3294_s15  ;;  %p3782_p1 = scmp.eq.s32.totalorder %s3364_s19, 0 }
   0x8   : > { %p134_p3 = scmp.eq.s32.totalorder %s2232_s20, 1  ;;  %p2233_p5 = scmp.ge.s32.totalorder %s3306_s18, 1 }
   0x9   : > { %p3373_p4 = por %p3782_p1, %p41_p0  ;;  %p141_p7 = scmp.lt.s32.totalorder %s3306_s18, 3 }
   0xa   : > { %p3378_p6 = por %p134_p3, %p41_p0  ;;  %s3308_s24 = smov [#allocation5]  }
   0xb   : > { %s3785_s21 = scalar_select %p3373_p4, 1, 0 }
   0xc   : > { %s3786_s22 = scalar_select %p3378_p6, 1, 0 }
   0xd   : > { %p3383_p8 = pnand %p2233_p5, %p141_p7  ;;  %s153_s25 = sshll.u32 %s3308_s24, 4  ;;  %s3387_s25 = int_to_ptr.vmem [resolvable:$true] %s153_s25 }
   0xe   : > { %s3309_s27 = smov [#allocation7]   ;;  %s3150_s5 = scalar_lea.hbm %s3778_s1, 10240 }
   0xf   : > { %p2881_p9 = pneg %p3383_p8  ;;  %s169_s28 = sshll.u32 %s3309_s27, 4  ;;  %s3398_s28 = int_to_ptr.vmem [resolvable:$true] %s169_s28 }
  0x10   : > { %p3151_p12 = scmp.ne.s32.totalorder %s3778_s1, %s3150_s5  ;;  %p3157_p5 = scmp.lt.u32.totalorder %s3150_s5, %s3778_s1 }
  0x11   : > { %p3394_p11 = pnand %p2881_p9, %p3782_p1 }
  0x13   : > { %p3152_p13 = pneg %p3394_p11 }
  0x15   : > { %p3153_p0 = pnand %p3152_p13, %p3151_p12 }
  0x17   : > { %p3154_p3 = pneg %p3153_p0 }
  0x19   : > { %p3159_p7 = pnand %p3157_p5, %p3154_p3 }
  0x1b   : > { %3162 = shalt.err (!%p3159_p7)
}
  0x1c   : > { %s3163_s10 = scalar_lea.vmem %s3387_s25, 10240  ;;  %p3171_p2 = scmp.lt.s32.totalorder %s3387_s25, %s3387_s25 }
  0x1d   : > { %p3164_p9 = scmp.ne.s32.totalorder %s3387_s25, %s3163_s10  ;;  %p3172_p12 = scmp.lt.s32.totalorder %s3163_s10, %s3163_s10 }
  0x1f   : > { %p3166_p10 = pnand %p3164_p9, %p3152_p13  ;;  %p3173_p0 = por %p3172_p12, %p3171_p2 }
  0x21   : > { %p3167_p1 = pneg %p3166_p10 }
  0x23   : > { %p3174_p6 = pnand %p3173_p0, %p3167_p1 }
  0x25   : > { %3177 = shalt.err (!%p3174_p6)
}
  0x26   : > { %s3310_s11 = smov 64   ;;  %s3311_s12 = smov 4  }
  0x27   : > { %2884 = dma.hbm_to_vmem [thread:$0]  (!%p3394_p11), %s3778_s1, 10240, %s3387_s25, [#allocation6], %s3310_s11, %s3310_s11, %s3311_s12  }
  0x28   : > { %s3178_s27 = scalar_lea.hbm %s3780_s3, 1024 }
  0x29   : > { %p3179_p2 = scmp.ne.s32.totalorder %s3780_s3, %s3178_s27  ;;  %p3185_p10 = scmp.lt.u32.totalorder %s3178_s27, %s3780_s3 }
  0x2b   : > { %p3181_p1 = pnand %p3179_p2, %p3152_p13 }
  0x2d   : > { %p3182_p6 = pneg %p3181_p1 }
  0x2f   : > { %p3187_p3 = pnand %p3185_p10, %p3182_p6 }
  0x31   : > { %3190 = shalt.err (!%p3187_p3)
}
  0x32   : > { %s3191_s25 = scalar_lea.vmem %s3398_s28, 1024  ;;  %p3199_p12 = scmp.lt.s32.totalorder %s3398_s28, %s3398_s28 }
  0x33   : > { %p3192_p5 = scmp.ne.s32.totalorder %s3398_s28, %s3191_s25  ;;  %p3200_p0 = scmp.lt.s32.totalorder %s3191_s25, %s3191_s25 }
  0x35   : > { %p3194_p7 = pnand %p3192_p5, %p3152_p13  ;;  %p3201_p2 = por %p3200_p0, %p3199_p12 }
  0x37   : > { %p3195_p9 = pneg %p3194_p7 }
  0x39   : > { %p3202_p1 = pnand %p3201_p2, %p3195_p9 }
  0x3b   : > { %3205 = shalt.err (!%p3202_p1)
}
  0x3c   : > { %2887 = dma.hbm_to_vmem [thread:$0]  (!%p3394_p11), %s3780_s3, 1024, %s3398_s28, [#allocation6], %s3310_s11, %s3310_s11, %s3311_s12  }
  0x3d   : > { %s3453_s9 = sadd.s32 1, %s3306_s18   ;;  %s28_s26 = sadd.s32 1, %s3302_s17 }
  0x3e   : > { %s25_s10 = ssub.s32 %s3306_s18, %s3453_s9  ;;  %p35_p13 = scmp.ne.s32.totalorder %s3302_s17, %s3298_s16 }
  0x3f   : > { %p26_p6 = scmp.eq.s32.totalorder %s25_s10, 0  ;;  %p36_p10 = scmp.eq.s32.totalorder %s3306_s18, 0 }
  0x40   : > { %p3789_p3 = scmp.eq.s32.totalorder %s3364_s19, 1  ;;  %p2898_p7 = scmp.lt.s32.totalorder %s3306_s18, 2 }
  0x41   : > { %s3469_s14 = scalar_select %p26_p6, %s3302_s17, %s28_s26  }
  0x42   : > { %p3463_p5 = por %p3789_p3, %p35_p13  ;;  %p37_p9 = por %p36_p10, %p35_p13 }
  0x43   : > { %s183_s20 = sand.u32 1, %s3302_s17   ;;  %s2867_s28 = smul.u32 10240, %s3306_s18 }
  0x44   : > { %s3790_s13 = scalar_select %p3463_p5, 1, 0 }
  0x45   : > { %s2866_s24 = smul.u32 640, %s183_s20  ;;  %p3473_p11 = pnand %p2898_p7, %p37_p9 }
  0x46   : > { %s3480_s29 = scalar_lea.hbm %s3777_s0, %s2867_s28  ;;  %s3484_s6 = scalar_lea.sflag [#allocation3], %s183_s20 }
  0x47   : > { %s187_s30 = scalar_lea.vmem [#allocation2], %s2866_s24  ;;  %s3206_s25 = scalar_lea.hbm %s3480_s29, 10240 }
  0x48   : > { %s195_s5 = sshll.u32 %s187_s30, 4  ;;  %p3207_p12 = scmp.ne.s32.totalorder %s3480_s29, %s3206_s25  ;;  %s3482_s5 = int_to_ptr.vmem [resolvable:$true] %s195_s5 }
  0x49   : > { %p3208_p0 = pneg %p3473_p11  ;;  %s3211_s26 = scalar_lea.hbm %s3777_s0, 20480 }
  0x4a   : > { %p3212_p13 = scmp.lt.u32.totalorder %s3480_s29, %s3777_s0  ;;  %p3213_p6 = scmp.lt.u32.totalorder %s3211_s26, %s3206_s25 }
  0x4b   : > { %p3209_p2 = pnand %p3208_p0, %p3207_p12  ;;  %p3215_p3 = scmp.lt.u32.totalorder %s3206_s25, %s3480_s29 }
  0x4c   : > { %p3214_p10 = por %p3213_p6, %p3212_p13 }
  0x4d   : > { %p3210_p1 = pneg %p3209_p2 }
  0x4e   : > { %p3216_p7 = por %p3215_p3, %p3214_p10 }
  0x50   : > { %p3217_p9 = pnand %p3216_p7, %p3210_p1 }
  0x52   : > { %3220 = shalt.err (!%p3217_p9)
}
  0x53   : > { %s3221_s20 = scalar_lea.vmem %s3482_s5, 10240  ;;  %s3312_s24 = smov [#allocation2]  }
  0x54   : > { %p3222_p12 = scmp.ne.s32.totalorder %s3482_s5, %s3221_s20  ;;  %s3226_s12 = sshll.u32 %s3312_s24, 4  ;;  %s3227_s12 = int_to_ptr.vmem [resolvable:$false] %s3226_s12 }
  0x55   : > { %s3228_s27 = scalar_lea.vmem %s3227_s12, 20480  ;;  %p3229_p4 = scmp.lt.s32.totalorder %s3482_s5, %s3227_s12 }
  0x56   : > { %p3224_p2 = pnand %p3222_p12, %p3208_p0  ;;  %p3230_p13 = scmp.lt.s32.totalorder %s3228_s27, %s3221_s20 }
  0x58   : > { %p3225_p5 = pneg %p3224_p2  ;;  %p3231_p6 = por %p3230_p13, %p3229_p4 }
  0x5a   : > { %p3232_p10 = pnand %p3231_p6, %p3225_p5 }
  0x5c   : > { %3235 = shalt.err (!%p3232_p10)
}
  0x5d   : > { %s3313_s30 = smov 640   ;;  %s3314_s25 = smov 40  }
  0x5e   : > { %2891 = dma.hbm_to_vmem [thread:$0]  (!%p3473_p11), %s3480_s29, 10240, %s3482_s5, %s3484_s6, %s3313_s30, %s3313_s30, %s3314_s25  }
  0x5f   : > { %207 = sbr.rel (%p3383_p8) target bundleno = 778 (0x30a), region = 36  ;;  %s3515_s7 = sand.u32 (!%p3383_p8), 1, %s3298_s16  }
  0x60   : > { %s2868_s8 = smul.u32 (!%p3383_p8), 640, %s3515_s7  ;;  %s210_s26 = scalar_lea.sflag (!%p3383_p8), [#allocation3], %s3515_s7 }
  0x61   : > { %p3792_p4 = scmp.ne.s32.totalorder (!%p3383_p8), %s3785_s21, 0 }
  0x62   : > { %s3519_s10 = scalar_lea.vmem (!%p3383_p8), [#allocation2], %s2868_s8 }
  0x66   : > { %3281 = dma.done.wait (%p3792_p4), %s210_s26, 10240  }
  0x67   : > { %3283 = vsyncadd (%p3792_p4), %s210_s26, 4294957056  ;;  %p3793_p5 = scmp.eq.s32.totalorder %s3364_s19, 0 }
  0x69   : > { %3285 = dma.done.wait (%p3793_p5), [#allocation6], 11264   ;;  %p3794_p8 = pmov %p3793_p5 }
  0x6a   : > { %v2942_v0 = vld [vmem:[#allocation5 + $0x40] sm:$0xff]   ;;  %v2946_v4 = vld [vmem:[#allocation5 + $0x48] sm:$0xff]   ;;  %v2950_v8 = vld [vmem:[#allocation5 + $0x50] sm:$0xff]   ;;  %s2243_s11 = sshll.u32 %s3515_s7, 6  ;;  %s2450_s6 = sshll.u32 %s3364_s19, 10 }
  0x6b   : > { %3287 = vsyncadd (%p3794_p8), [#allocation6], 4294956032  ;;  %v2943_v1 = vld [vmem:[#allocation5] sm:$0xff]   ;;  %2498 = vmatprep.subr.bf16.mxu0 %v2942_v0  ;;  %v2947_v5 = vld [vmem:[#allocation5 + $0x8] sm:$0xff]   ;;  %s245_s29 = scalar_lea.vmem [#allocation8], %s2243_s11  ;;  %s3733_s24 = scalar_lea.hbm %s3781_s4, %s2450_s6 }
  0x6c   : > { %v2944_v2 = vld [vmem:[#allocation5 + $0xc0] sm:$0xff]   ;;  %2499 = vmatpush3.bf16.msra.mxu0 %v2943_v1  ;;  %v2948_v6 = vld [vmem:[#allocation5 + $0xc8] sm:$0xff]   ;;  %v2951_v9 = vld [vmem:[#allocation5 + $0x10] sm:$0xff]   ;;  %s2140_s5 = sshll.u32 %s245_s29, 4  ;;  %s2127_s12 = scalar_lea.sflag [#allocation4], %s3515_s7  ;;  %s3728_s5 = int_to_ptr.vmem [resolvable:$true] %s2140_s5 }
  0x6d   : > { %v2945_v3 = vld [vmem:[#allocation5 + $0x80] sm:$0xff]   ;;  %2562 = vmatprep.subr.bf16.mxu1 %v2944_v2  ;;  %2500 = vmatprep.subr.bf16.mxu0 %v2946_v4  ;;  %v2949_v7 = vld [vmem:[#allocation5 + $0x88] sm:$0xff]   ;;  %v2952_v10 = vld [vmem:[#allocation5 + $0xd0] sm:$0xff]   ;;  %s3236_s27 = scalar_lea.vmem %s3728_s5, 1024  ;;  %p3795_p0 = scmp.ne.s32.totalorder %s3790_s13, 0 }
  0x6e   : > { %2563 = vmatpush3.bf16.msra.mxu1 %v2945_v3  ;;  %v2953_v11 = vld [vmem:[#allocation5 + $0x90] sm:$0xff]   ;;  %v2954_v12 = vld [vmem:[#allocation5 + $0x58] sm:$0xff]   ;;  %v2958_v16 = vld [vmem:[#allocation5 + $0x60] sm:$0xff]   ;;  %p3237_p11 = scmp.ne.s32.totalorder %s3728_s5, %s3236_s27  ;;  %s3315_s19 = smov [#allocation8]  }
  0x6f   : > { %2564 = vmatprep.subr.bf16.mxu1 %v2948_v6  ;;  %v2955_v13 = vld [vmem:[#allocation5 + $0x18] sm:$0xff]   ;;  %v2959_v17 = vld [vmem:[#allocation5 + $0x20] sm:$0xff]   ;;  %v2962_v20 = vld [vmem:[#allocation5 + $0x68] sm:$0xff]   ;;  %s3240_s30 = sshll.u32 %s3315_s19, 4  ;;  %s3241_s30 = int_to_ptr.vmem [resolvable:$false] %s3240_s30 }
  0x70   : > { %2501 = vmatpush3.bf16.msra.mxu0 %v2947_v5  ;;  %v2956_v14 = vld [vmem:[#allocation5 + $0xd8] sm:$0xff]   ;;  %v2960_v18 = vld [vmem:[#allocation5 + $0xe0] sm:$0xff]   ;;  %v2963_v21 = vld [vmem:[#allocation5 + $0x28] sm:$0xff]   ;;  %p3238_p1 = pnand %p3237_p11, %p3795_p0  ;;  %s3242_s25 = scalar_lea.vmem %s3241_s30, 2048 }
  0x71   : > { %2502 = vmatprep.subr.bf16.mxu0 %v2950_v8  ;;  %v2957_v15 = vld [vmem:[#allocation5 + $0x98] sm:$0xff]   ;;  %v2961_v19 = vld [vmem:[#allocation5 + $0xa0] sm:$0xff]   ;;  %v2964_v22 = vld [vmem:[#allocation5 + $0xe8] sm:$0xff]   ;;  %p3243_p7 = scmp.lt.s32.totalorder %s3728_s5, %s3241_s30  ;;  %p3244_p9 = scmp.lt.s32.totalorder %s3242_s25, %s3236_s27 }
  0x72   : > { %2565 = vmatpush3.bf16.msra.mxu1 %v2949_v7  ;;  %v2965_v23 = vld [vmem:[#allocation5 + $0xa8] sm:$0xff]   ;;  %v2966_v24 = vld [vmem:[#allocation5 + $0x70] sm:$0xff]   ;;  %v2970_v28 = vld [vmem:[#allocation5 + $0x78] sm:$0xff]   ;;  %p3239_p3 = pneg %p3238_p1 }
  0x73   : > { %2566 = vmatprep.subr.bf16.mxu1 %v2952_v10  ;;  %v2967_v25 = vld [vmem:[#allocation5 + $0x30] sm:$0xff]   ;;  %v2971_v29 = vld [vmem:[#allocation5 + $0x38] sm:$0xff]   ;;  %v2973_v31 = vld [vmem:[%s3519_s10] ss:$40 sps:$4 sm:$0xff]   ;;  %p3245_p12 = por %p3244_p9, %p3243_p7 }
  0x74   : > { %2503 = vmatpush3.bf16.msra.mxu0 %v2951_v9  ;;  %v2968_v26 = vld [vmem:[#allocation5 + $0xf0] sm:$0xff]   ;;  %v2972_v30 = vld [vmem:[#allocation5 + $0xf8] sm:$0xff]   ;;  %v2975_v32 = vld [vmem:[%s3519_s10 + $0x4] ss:$40 sps:$4 sm:$0xff]  }
  0x75   : > { %2504 = vmatprep.subr.bf16.mxu0 %v2954_v12  ;;  %v2969_v27 = vld [vmem:[#allocation5 + $0xb0] sm:$0xff]   ;;  %v2976_v33 = vld [vmem:[#allocation5 + $0xb8] sm:$0xff]   ;;  %1408 = vmatprep.mubr.bf16.mxu0 %v2975_v32  ;;  %v2977_v34 = vld [vmem:[#allocation5 + $0x140] sm:$0xff]   ;;  %p3246_p2 = pnand %p3245_p12, %p3239_p3 }
  0x76   : > { %2567 = vmatpush3.bf16.msra.mxu1 %v2953_v11  ;;  %v2978_v35 = vld [vmem:[%s3519_s10 + $0x8] ss:$40 sps:$4 sm:$0xff]   ;;  %v2980_v36 = vld [vmem:[%s3519_s10 + $0xc] ss:$40 sps:$4 sm:$0xff]   ;;  %v2981_v37 = vld [vmem:[#allocation5 + $0x100] sm:$0xff]  }
  0x77   : > { %2568 = vmatprep.subr.bf16.mxu1 %v2956_v14  ;;  %1505 = vmatprep.mubr.bf16.mxu1 %v2980_v36  ;;  %v2982_v38 = vld [vmem:[%s3519_s10 + $0x54] ss:$40 sps:$4 sm:$0xff]   ;;  %v2984_v39 = vld [vmem:[%s3519_s10 + $0x50] ss:$40 sps:$4 sm:$0xff]   ;;  %v2985_v40 = vld [vmem:[#allocation5 + $0x148] sm:$0xff]  }
  0x78   : > { %2505 = vmatpush3.bf16.msra.mxu0 %v2955_v13  ;;  %v2986_v41 = vld [vmem:[%s3519_s10 + $0x5c] ss:$40 sps:$4 sm:$0xff]   ;;  %v2988_v42 = vld [vmem:[#allocation5 + $0x108] sm:$0xff]   ;;  %v2989_v43 = vld [vmem:[%s3519_s10 + $0x58] ss:$40 sps:$4 sm:$0xff]  }
  0x79   : > { %2506 = vmatprep.subr.bf16.mxu0 %v2958_v16  ;;  %v2990_v44 = vld [vmem:[%s3519_s10 + $0xa4] ss:$40 sps:$4 sm:$0xff]   ;;  %v2993_v45 = vld [vmem:[#allocation5 + $0x150] sm:$0xff]   ;;  %v2992_v48 = vld [vmem:[%s3519_s10 + $0xa0] ss:$40 sps:$4 sm:$0xff]  }
  0x7a   : > { %2569 = vmatpush3.bf16.msra.mxu1 %v2957_v15  ;;  %v2994_v46 = vld [vmem:[%s3519_s10 + $0xac] ss:$40 sps:$4 sm:$0xff]   ;;  %v3001_v50 = vld [vmem:[#allocation5 + $0x158] sm:$0xff]   ;;  %v2997_v51 = vld [vmem:[%s3519_s10 + $0xa8] ss:$40 sps:$4 sm:$0xff]  }
  0x7b   : > { %2570 = vmatprep.subr.bf16.mxu1 %v2960_v18  ;;  %v2996_v47 = vld [vmem:[#allocation5 + $0x110] sm:$0xff]   ;;  %v3004_v52 = vld [vmem:[#allocation5 + $0x118] sm:$0xff]   ;;  %v3009_v54 = vld [vmem:[#allocation5 + $0x160] sm:$0xff]  }
  0x7c   : > { %2507 = vmatpush3.bf16.msra.mxu0 %v2959_v17  ;;  %v2998_v49 = vld [vmem:[%s3519_s10 + $0xf4] ss:$40 sps:$4 sm:$0xff]   ;;  %v3000_v55 = vld [vmem:[%s3519_s10 + $0xf0] ss:$40 sps:$4 sm:$0xff]   ;;  %v3012_v56 = vld [vmem:[#allocation5 + $0x120] sm:$0xff]  }
  0x7d   : > { %2508 = vmatprep.subr.bf16.mxu0 %v2962_v20  ;;  %v3002_v53 = vld [vmem:[%s3519_s10 + $0xfc] ss:$40 sps:$4 sm:$0xff]   ;;  %v3005_v58 = vld [vmem:[%s3519_s10 + $0xf8] ss:$40 sps:$4 sm:$0xff]   ;;  %v3016_v61 = vld [vmem:[#allocation5 + $0x1c8] sm:$0xff]  }
  0x7e   : > { %2571 = vmatpush3.bf16.msra.mxu1 %v2961_v19  ;;  %v3006_v57 = vld [vmem:[%s3519_s10 + $0x144] ss:$40 sps:$4 sm:$0xff]   ;;  %v3008_v1 = vld [vmem:[%s3519_s10 + $0x140] ss:$40 sps:$4 sm:$0xff]   ;;  %v3017_v2 = vld [vmem:[%s3519_s10 + $0x194] ss:$40 sps:$4 sm:$0xff]  }
  0x7f   : > { %2572 = vmatprep.subr.bf16.mxu1 %v2964_v22  ;;  %v3014_v59 = vld [vmem:[#allocation5 + $0x1c0] sm:$0xff]   ;;  %v3010_v62 = vld [vmem:[%s3519_s10 + $0x14c] ss:$40 sps:$4 sm:$0xff]   ;;  %v3013_v4 = vld [vmem:[%s3519_s10 + $0x148] ss:$40 sps:$4 sm:$0xff]  }
  0x80   : > { %2509 = vmatpush3.bf16.msra.mxu0 %v2963_v21  ;;  %v3015_v60 = vld [vmem:[#allocation5 + $0x180] sm:$0xff]   ;;  %v3019_v63 = vld [vmem:[#allocation5 + $0x188] sm:$0xff]   ;;  %v3026_v5 = vld [vmem:[#allocation5 + $0x1d0] sm:$0xff]  }
  0x81   : > { %2510 = vmatprep.subr.bf16.mxu0 %v2966_v24  ;;  %v3021_v0 = vld [vmem:[#allocation5 + $0x168] sm:$0xff]   ;;  %v3027_v6 = vld [vmem:[#allocation5 + $0x190] sm:$0xff]   ;;  %v3028_v7 = vld [vmem:[#allocation5 + $0x1d8] sm:$0xff]  }
  0x82   : > { %2573 = vmatpush3.bf16.msra.mxu1 %v2965_v23  ;;  %v3024_v3 = vld [vmem:[#allocation5 + $0x128] sm:$0xff]   ;;  %v3022_v8 = vld [vmem:[%s3519_s10 + $0x19c] ss:$40 sps:$4 sm:$0xff]   ;;  %v3033_v10 = vld [vmem:[#allocation5 + $0x170] sm:$0xff]  }
  0x83   : > { %2574 = vmatprep.subr.bf16.mxu1 %v2968_v26  ;;  %v3031_v9 = vld [vmem:[#allocation5 + $0x198] sm:$0xff]   ;;  %v3029_v13 = vld [vmem:[%s3519_s10 + $0x1e4] ss:$40 sps:$4 sm:$0xff]   ;;  %v3036_v14 = vld [vmem:[#allocation5 + $0x130] sm:$0xff]  }
  0x84   : > { %2511 = vmatpush3.bf16.msra.mxu0 %v2967_v25  ;;  %v3020_v11 = vld [vmem:[%s3519_s10 + $0x190] ss:$40 sps:$4 sm:$0xff]   ;;  %v3034_v15 = vld [vmem:[%s3519_s10 + $0x1ec] ss:$40 sps:$4 sm:$0xff]   ;;  %v3038_v16 = vld [vmem:[#allocation5 + $0x1e0] sm:$0xff]  }
  0x85   : > { %2512 = vmatprep.subr.bf16.mxu0 %v2970_v28  ;;  %v3025_v12 = vld [vmem:[%s3519_s10 + $0x198] ss:$40 sps:$4 sm:$0xff]   ;;  %v3040_v18 = vld [vmem:[#allocation5 + $0x1e8] sm:$0xff]   ;;  %v3041_v22 = vld [vmem:[%s3519_s10 + $0x234] ss:$40 sps:$4 sm:$0xff]  }
  0x86   : > { %2575 = vmatpush3.bf16.msra.mxu1 %v2969_v27  ;;  %v3039_v17 = vld [vmem:[#allocation5 + $0x1a0] sm:$0xff]   ;;  %v3043_v20 = vld [vmem:[#allocation5 + $0x1a8] sm:$0xff]   ;;  %v3045_v21 = vld [vmem:[#allocation5 + $0x178] sm:$0xff]  }
  0x87   : > { %2576 = vmatprep.subr.bf16.mxu1 %v2972_v30  ;;  %v3032_v19 = vld [vmem:[%s3519_s10 + $0x1e0] ss:$40 sps:$4 sm:$0xff]   ;;  %v3048_v24 = vld [vmem:[#allocation5 + $0x138] sm:$0xff]   ;;  %v3050_v26 = vld [vmem:[#allocation5 + $0x1f0] sm:$0xff]  }
  0x88   : > { %2513 = vmatpush3.bf16.msra.mxu0 %v2971_v29  ;;  %v3037_v23 = vld [vmem:[%s3519_s10 + $0x1e8] ss:$40 sps:$4 sm:$0xff]   ;;  %v3046_v25 = vld [vmem:[%s3519_s10 + $0x23c] ss:$40 sps:$4 sm:$0xff]  }
  0x89   : > { %2626 = vmatprep.subr.bf16.mxu0 %v2977_v34  ;;  %v3051_v27 = vld [vmem:[#allocation5 + $0x1b0] sm:$0xff]   ;;  %v3052_v28 = vld [vmem:[#allocation5 + $0x1f8] sm:$0xff]   ;;  %v3061_v36 = vld [vmem:[#allocation5 + $0x200] sm:$0xff]  }
  0x8a   : > { %2577 = vmatpush3.bf16.msra.mxu1 %v2976_v33  ;;  %v3044_v29 = vld [vmem:[%s3519_s10 + $0x230] ss:$40 sps:$4 sm:$0xff]   ;;  %v3055_v32 = vld [vmem:[%s3519_s10 + $0x14] ss:$40 sps:$4 sm:$0xff]  }
  0x8b   : > { %1409 = vmatmul.mubr.bf16.vlgmr.msra.gmra.mrb[0].mxu0 %v2973_v31  ;;  %2690 = vmatprep.subr.bf16.mxu1 %v3014_v59  ;;  %v3056_v30 = vld [vmem:[#allocation5 + $0x1b8] sm:$0xff]   ;;  %v3057_v31 = vld [vmem:[#allocation5 + $0x240] sm:$0xff]  }
  0x8c   : > { %2627 = vmatpush3.bf16.msra.mxu0 %v2981_v37  ;;  %1416 = vmatprep.mubr.bf16.mxu0 %v2982_v38  ;;  %v3049_v33 = vld [vmem:[%s3519_s10 + $0x238] ss:$40 sps:$4 sm:$0xff]   ;;  %v3060_v34 = vld [vmem:[%s3519_s10 + $0x1c] ss:$40 sps:$4 sm:$0xff]   ;;  %v3065_v38 = vld [vmem:[#allocation5 + $0x248] sm:$0xff]  }
  0x8d   : > { %1506 = vmatmul.mubr.bf16.vlgmr.msra.gmra.mrb[0].mxu1 %v2978_v35  ;;  %2628 = vmatprep.subr.bf16.mxu0 %v2985_v40  ;;  %v3053_v35 = vld [vmem:[%s3519_s10 + $0x10] ss:$40 sps:$4 sm:$0xff]   ;;  %v3062_v37 = vld [vmem:[%s3519_s10 + $0x64] ss:$40 sps:$4 sm:$0xff]   ;;  %v3080_v59 = vld [vmem:[%s3519_s10 + $0x100] ss:$40 sps:$4 sm:$0xff]  }
  0x8e   : > { %1513 = vmatprep.mubr.bf16.mxu1 %v2986_v41  ;;  %2691 = vmatpush3.bf16.msra.mxu1 %v3015_v60  ;;  %v3066_v40 = vld [vmem:[%s3519_s10 + $0x6c] ss:$40 sps:$4 sm:$0xff]  }
  0x8f   : > { %2692 = vmatprep.subr.bf16.mxu1 %v3016_v61  ;;  %v3068_v41 = vld [vmem:[#allocation5 + $0x208] sm:$0xff]   ;;  %v3086_v60 = vld [vmem:[%s3519_s10 + $0x154] ss:$40 sps:$4 sm:$0xff]  }
  0x90   : > { %2629 = vmatpush3.bf16.msra.mxu0 %v2988_v42  ;;  %v3073_v42 = vld [vmem:[#allocation5 + $0x250] sm:$0xff]  }
  0x91   : > { %2630 = vmatprep.subr.bf16.mxu0 %v2993_v45  ;;  %v3076_v45 = vld [vmem:[#allocation5 + $0x210] sm:$0xff]  }
  0x92   : > { %2693 = vmatpush3.bf16.msra.mxu1 %v3019_v63  ;;  %v3108_v61 = vld [vmem:[#allocation5 + $0x230] sm:$0xff]  }
  0x93   : > { %1417 = vmatmul.mubr.bf16.gmra.mrb[4].mxu0 %v2984_v39  ;;  %2694 = vmatprep.subr.bf16.mxu1 %v3026_v5  ;;  %v3058_v39 = vld [vmem:[%s3519_s10 + $0x18] ss:$40 sps:$4 sm:$0xff]   ;;  %v3085_v63 = vld [vmem:[%s3519_s10 + $0x108] ss:$40 sps:$4 sm:$0xff]   ;;  %v3098_v5 = vld [vmem:[%s3519_s10 + $0x1ac] ss:$40 sps:$4 sm:$0xff]  }
  0x94   : > { %1424 = vmatprep.mubr.bf16.mxu0 %v2990_v44  ;;  %2631 = vmatpush3.bf16.msra.mxu0 %v2996_v47  ;;  %v3070_v44 = vld [vmem:[%s3519_s10 + $0xb4] ss:$40 sps:$4 sm:$0xff]   ;;  %v3069_v47 = vld [vmem:[%s3519_s10 + $0x68] ss:$40 sps:$4 sm:$0xff]  }
  0x95   : > { %1514 = vmatmul.mubr.bf16.gmra.mrb[4].mxu1 %v2989_v43  ;;  %2632 = vmatprep.subr.bf16.mxu0 %v3001_v50  ;;  %v3064_v43 = vld [vmem:[%s3519_s10 + $0x60] ss:$40 sps:$4 sm:$0xff]  }
  0x96   : > { %1521 = vmatprep.mubr.bf16.mxu1 %v2994_v46  ;;  %2695 = vmatpush3.bf16.msra.mxu1 %v3027_v6  ;;  %v3081_v46 = vld [vmem:[#allocation5 + $0x258] sm:$0xff]   ;;  %v3089_v50 = vld [vmem:[#allocation5 + $0x260] sm:$0xff]  }
  0x97   : > { %2696 = vmatprep.subr.bf16.mxu1 %v3028_v7  ;;  %v3096_v6 = vld [vmem:[%s3519_s10 + $0x1a0] ss:$40 sps:$4 sm:$0xff]   ;;  %v3102_v7 = vld [vmem:[%s3519_s10 + $0x1f4] ss:$40 sps:$4 sm:$0xff]  }
  0x98   : > { %2633 = vmatpush3.bf16.msra.mxu0 %v3004_v52  ;;  %v3078_v52 = vld [vmem:[%s3519_s10 + $0x104] ss:$40 sps:$4 sm:$0xff]  }
  0x99   : > { %2634 = vmatprep.subr.bf16.mxu0 %v3009_v54  ;;  %v3097_v54 = vld [vmem:[#allocation5 + $0x268] sm:$0xff]  }
  0x9a   : > { %2697 = vmatpush3.bf16.msra.mxu1 %v3031_v9  ;;  %v3106_v9 = vld [vmem:[%s3519_s10 + $0x1fc] ss:$40 sps:$4 sm:$0xff]  }
  0x9b   : > { %1425 = vmatmul.mubr.bf16.gmra.mrb[8].mxu0 %v2992_v48  ;;  %2698 = vmatprep.subr.bf16.mxu1 %v3038_v16  ;;  %v3074_v48 = vld [vmem:[%s3519_s10 + $0xbc] ss:$40 sps:$4 sm:$0xff]   ;;  %v3117_v16 = vld [vmem:[%s3519_s10 + $0x248] ss:$40 sps:$4 sm:$0xff]  }
  0x9c   : > { %1432 = vmatprep.mubr.bf16.mxu0 %v2998_v49  ;;  %2635 = vmatpush3.bf16.msra.mxu0 %v3012_v56  ;;  %v3084_v49 = vld [vmem:[#allocation5 + $0x218] sm:$0xff]   ;;  %v3082_v56 = vld [vmem:[%s3519_s10 + $0x10c] ss:$40 sps:$4 sm:$0xff]  }
  0x9d   : > { %1522 = vmatmul.mubr.bf16.gmra.mrb[8].mxu1 %v2997_v51  ;;  %2636 = vmatprep.subr.bf16.mxu0 %v3021_v0  ;;  %v3072_v51 = vld [vmem:[%s3519_s10 + $0xb0] ss:$40 sps:$4 sm:$0xff]   ;;  %v3090_v0 = vld [vmem:[%s3519_s10 + $0x15c] ss:$40 sps:$4 sm:$0xff]  }
  0x9e   : > { %1529 = vmatprep.mubr.bf16.mxu1 %v3002_v53  ;;  %2699 = vmatpush3.bf16.msra.mxu1 %v3039_v17  ;;  %v3092_v53 = vld [vmem:[#allocation5 + $0x220] sm:$0xff]  }
  0x9f   : > { %2700 = vmatprep.subr.bf16.mxu1 %v3040_v18  ;;  %v3118_v17 = vld [vmem:[%s3519_s10 + $0x20] ss:$40 sps:$4 sm:$0xff]   ;;  %v3121_v18 = vld [vmem:[%s3519_s10 + $0x74] ss:$40 sps:$4 sm:$0xff]  }
  0xa0   : > { %2637 = vmatpush3.bf16.msra.mxu0 %v3024_v3  ;;  %v3094_v3 = vld [vmem:[%s3519_s10 + $0x1a4] ss:$40 sps:$4 sm:$0xff]  }
  0xa1   : > { %2638 = vmatprep.subr.bf16.mxu0 %v3033_v10  ;;  %v3104_v10 = vld [vmem:[%s3519_s10 + $0x1f0] ss:$40 sps:$4 sm:$0xff]  }
  0xa2   : > { %2701 = vmatpush3.bf16.msra.mxu1 %v3043_v20  ;;  %v3124_v20 = vld [vmem:[%s3519_s10 + $0xc4] ss:$40 sps:$4 sm:$0xff]  }
  0xa3   : > { %1433 = vmatmul.mubr.bf16.gmra.mrb[12].mxu0 %v3000_v55  ;;  %2702 = vmatprep.subr.bf16.mxu1 %v3050_v26  ;;  %v3077_v55 = vld [vmem:[%s3519_s10 + $0xb8] ss:$40 sps:$4 sm:$0xff]   ;;  %v3133_v26 = vld [vmem:[%s3519_s10 + $0x1b4] ss:$40 sps:$4 sm:$0xff]  }
  0xa4   : > { %1440 = vmatprep.mubr.bf16.mxu0 %v3006_v57  ;;  %2639 = vmatpush3.bf16.msra.mxu0 %v3036_v14  ;;  %v3100_v57 = vld [vmem:[#allocation5 + $0x228] sm:$0xff]  }
  0xa5   : > { %1530 = vmatmul.mubr.bf16.gmra.mrb[12].mxu1 %v3005_v58  ;;  %2640 = vmatprep.subr.bf16.mxu0 %v3045_v21  ;;  %v3105_v58 = vld [vmem:[#allocation5 + $0x270] sm:$0xff]   ;;  %v3112_v14 = vld [vmem:[%s3519_s10 + $0x240] ss:$40 sps:$4 sm:$0xff]  }
  0xa6   : > { %1537 = vmatprep.mubr.bf16.mxu1 %v3010_v62  ;;  %2703 = vmatpush3.bf16.msra.mxu1 %v3051_v27  ;;  %v3113_v62 = vld [vmem:[#allocation5 + $0x278] sm:$0xff]   ;;  %v3126_v21 = vld [vmem:[%s3519_s10 + $0xc0] ss:$40 sps:$4 sm:$0xff]  }
  0xa7   : > { %2704 = vmatprep.subr.bf16.mxu1 %v3052_v28  ;;  %v3135_v27 = vld [vmem:[%s3519_s10 + $0x1b0] ss:$40 sps:$4 sm:$0xff]   ;;  %v3136_v28 = vld [vmem:[%s3519_s10 + $0x204] ss:$40 sps:$4 sm:$0xff]  }
  0xa8   : > { %2641 = vmatpush3.bf16.msra.mxu0 %v3048_v24  ;;  %v3130_v24 = vld [vmem:[%s3519_s10 + $0x164] ss:$40 sps:$4 sm:$0xff]  }
  0xa9   : > { %2754 = vmatprep.subr.bf16.mxu0 %v3057_v31  ;;  %v3141_v31 = vld [vmem:[%s3519_s10 + $0x250] ss:$40 sps:$4 sm:$0xff]  }
  0xaa   : > { %2705 = vmatpush3.bf16.msra.mxu1 %v3056_v30  ;;  %v3139_v30 = vld [vmem:[%s3519_s10 + $0x254] ss:$40 sps:$4 sm:$0xff]  }
  0xab   : > { %1441 = vmatmul.mubr.bf16.gmra.mrb[16].mxu0 %v3008_v1  ;;  %v3116_v1 = vld [vmem:[#allocation5 + $0x238] sm:$0xff]  }
  0xac   : > { %1448 = vmatprep.mubr.bf16.mxu0 %v3017_v2  ;;  %v3088_v2 = vld [vmem:[%s3519_s10 + $0x150] ss:$40 sps:$4 sm:$0xff]  }
  0xad   : > { %1538 = vmatmul.mubr.bf16.gmra.mrb[16].mxu1 %v3013_v4  ;;  %v3093_v4 = vld [vmem:[%s3519_s10 + $0x158] ss:$40 sps:$4 sm:$0xff]  }
  0xae   : > { %1545 = vmatprep.mubr.bf16.mxu1 %v3022_v8  ;;  %v3101_v8 = vld [vmem:[%s3519_s10 + $0x1a8] ss:$40 sps:$4 sm:$0xff]  }
  0xb3   : > { %1449 = vmatmul.mubr.bf16.gmra.mrb[20].mxu0 %v3020_v11  ;;  %v3110_v11 = vld [vmem:[%s3519_s10 + $0x244] ss:$40 sps:$4 sm:$0xff]  }
  0xb4   : > { %1456 = vmatprep.mubr.bf16.mxu0 %v3029_v13  ;;  %v3114_v13 = vld [vmem:[%s3519_s10 + $0x24c] ss:$40 sps:$4 sm:$0xff]  }
  0xb5   : > { %1546 = vmatmul.mubr.bf16.gmra.mrb[20].mxu1 %v3025_v12  ;;  %v3109_v12 = vld [vmem:[%s3519_s10 + $0x1f8] ss:$40 sps:$4 sm:$0xff]  }
  0xb6   : > { %1553 = vmatprep.mubr.bf16.mxu1 %v3034_v15  ;;  %v3120_v15 = vld [vmem:[%s3519_s10 + $0x24] ss:$40 sps:$4 sm:$0xff]  }
  0xbb   : > { %1457 = vmatmul.mubr.bf16.gmra.mrb[24].mxu0 %v3032_v19  ;;  %v3123_v19 = vld [vmem:[%s3519_s10 + $0x70] ss:$40 sps:$4 sm:$0xff]  }
  0xbc   : > { %1464 = vmatprep.mubr.bf16.mxu0 %v3041_v22  ;;  %v3127_v22 = vld [vmem:[%s3519_s10 + $0x114] ss:$40 sps:$4 sm:$0xff]  }
  0xbd   : > { %1554 = vmatmul.mubr.bf16.gmra.mrb[24].mxu1 %v3037_v23  ;;  %v3129_v23 = vld [vmem:[%s3519_s10 + $0x110] ss:$40 sps:$4 sm:$0xff]  }
  0xbe   : > { %1561 = vmatprep.mubr.bf16.mxu1 %v3046_v25  ;;  %v3132_v25 = vld [vmem:[%s3519_s10 + $0x160] ss:$40 sps:$4 sm:$0xff]  }
  0xc3   : > { %1465 = vmatmul.mubr.bf16.gmra.mrb[28].mxu0 %v3044_v29  ;;  %v3138_v29 = vld [vmem:[%s3519_s10 + $0x200] ss:$40 sps:$4 sm:$0xff]  }
  0xc4   : > { %1602 = vmatprep.mubr.bf16.mxu0 %v3055_v32  ;;  %v3142_v32 = vld [vmem:[#allocation7] sm:$0xff]  }
  0xc5   : > { %1562 = vmatmul.mubr.bf16.gmra.mrb[28].mxu1 %v3049_v33  ;;  %2834 = vmatprep.subr.bf16.mxu1 %v3142_v32  ;;  %v3143_v33 = vld [vmem:[#allocation7 + $0x8] sm:$0xff]  }
  0xc6   : > { %1699 = vmatprep.mubr.bf16.mxu1 %v3060_v34  ;;  %v3144_v34 = vld [vmem:[#allocation7 + $0x10] sm:$0xff]  }
  0xcb   : > { %1603 = vmatmul.mubr.bf16.vlgmr.msra.gmra.mrb[32].mxu0 %v3053_v35  ;;  %v3145_v35 = vld [vmem:[#allocation7 + $0x18] sm:$0xff]  }
  0xcc   : > { %2755 = vmatpush3.bf16.msra.mxu0 %v3061_v36  ;;  %1610 = vmatprep.mubr.bf16.mxu0 %v3062_v37  ;;  %v3612_v37 = vld [vmem:[%s3779_s2] ss:$0 sm:$0xff] }
  0xcd   : > { %2756 = vmatprep.subr.bf16.mxu0 %v3065_v38  ;;  %1700 = vmatmul.mubr.bf16.vlgmr.msra.gmra.mrb[32].mxu1 %v3058_v39 }
  0xce   : > { %1707 = vmatprep.mubr.bf16.mxu1 %v3066_v40  ;;  %2835 = vmatpush3.bf16.msra.mxu1 %v3142_v32 }
  0xcf   : > { %2836 = vmatprep.subr.bf16.mxu1 %v3143_v33 }
  0xd0   : > { %2757 = vmatpush3.bf16.msra.mxu0 %v3068_v41 }
  0xd1   : > { %2758 = vmatprep.subr.bf16.mxu0 %v3073_v42 }
  0xd2   : > { %2837 = vmatpush3.bf16.msra.mxu1 %v3143_v33 }
  0xd3   : > { %1611 = vmatmul.mubr.bf16.gmra.mrb[36].mxu0 %v3064_v43  ;;  %2838 = vmatprep.subr.bf16.mxu1 %v3144_v34  ;;  %v3146_v43 = vld [vmem:[#allocation7 + $0x20] sm:$0xff]  }
  0xd4   : > { %1618 = vmatprep.mubr.bf16.mxu0 %v3070_v44  ;;  %2759 = vmatpush3.bf16.msra.mxu0 %v3076_v45 }
  0xd5   : > { %2760 = vmatprep.subr.bf16.mxu0 %v3081_v46  ;;  %1708 = vmatmul.mubr.bf16.gmra.mrb[36].mxu1 %v3069_v47 }
  0xd6   : > { %1715 = vmatprep.mubr.bf16.mxu1 %v3074_v48  ;;  %2839 = vmatpush3.bf16.msra.mxu1 %v3144_v34 }
  0xd7   : > { %2840 = vmatprep.subr.bf16.mxu1 %v3145_v35 }
  0xd8   : > { %2761 = vmatpush3.bf16.msra.mxu0 %v3084_v49 }
  0xd9   : > { %2762 = vmatprep.subr.bf16.mxu0 %v3089_v50 }
  0xda   : > { %2841 = vmatpush3.bf16.msra.mxu1 %v3145_v35 }
  0xdb   : > { %1619 = vmatmul.mubr.bf16.gmra.mrb[40].mxu0 %v3072_v51  ;;  %2842 = vmatprep.subr.bf16.mxu1 %v3146_v43 }
  0xdc   : > { %1626 = vmatprep.mubr.bf16.mxu0 %v3078_v52  ;;  %2763 = vmatpush3.bf16.msra.mxu0 %v3092_v53  ;;  %v3147_v53 = vld [vmem:[#allocation7 + $0x28] sm:$0xff]  }
  0xdd   : > { %2764 = vmatprep.subr.bf16.mxu0 %v3097_v54  ;;  %1716 = vmatmul.mubr.bf16.gmra.mrb[40].mxu1 %v3077_v55 }
  0xde   : > { %1723 = vmatprep.mubr.bf16.mxu1 %v3082_v56  ;;  %2843 = vmatpush3.bf16.msra.mxu1 %v3146_v43 }
  0xdf   : > { %2844 = vmatprep.subr.bf16.mxu1 %v3147_v53 }
  0xe0   : > { %2765 = vmatpush3.bf16.msra.mxu0 %v3100_v57 }
  0xe1   : > { %2766 = vmatprep.subr.bf16.mxu0 %v3105_v58 }
  0xe2   : > { %2845 = vmatpush3.bf16.msra.mxu1 %v3147_v53 }
  0xe3   : > { %1627 = vmatmul.mubr.bf16.gmra.mrb[44].mxu0 %v3080_v59 }
  0xe4   : > { %1634 = vmatprep.mubr.bf16.mxu0 %v3086_v60  ;;  %2767 = vmatpush3.bf16.msra.mxu0 %v3108_v61  ;;  %v3148_v61 = vld [vmem:[#allocation7 + $0x30] sm:$0xff]  }
  0xe5   : > { %2768 = vmatprep.subr.bf16.mxu0 %v3113_v62  ;;  %1724 = vmatmul.mubr.bf16.gmra.mrb[44].mxu1 %v3085_v63 }
  0xe6   : > { %1731 = vmatprep.mubr.bf16.mxu1 %v3090_v0  ;;  %2846 = vmatprep.subr.bf16.mxu1 %v3148_v61 }
  0xe7   : > { %2847 = vmatpush3.bf16.msra.mxu1 %v3148_v61 }
  0xe8   : > { %2769 = vmatpush3.bf16.msra.mxu0 %v3116_v1 }
  0xeb   : > { %1635 = vmatmul.mubr.bf16.gmra.mrb[48].mxu0 %v3088_v2 }
  0xec   : > { %1642 = vmatprep.mubr.bf16.mxu0 %v3094_v3 }
  0xed   : > { %1732 = vmatmul.mubr.bf16.gmra.mrb[48].mxu1 %v3093_v4 }
  0xee   : > { %1739 = vmatprep.mubr.bf16.mxu1 %v3098_v5 }
  0xf3   : > { %1643 = vmatmul.mubr.bf16.gmra.mrb[52].mxu0 %v3096_v6 }
  0xf4   : > { %1650 = vmatprep.mubr.bf16.mxu0 %v3102_v7  ;;  %v3149_v7 = vld [vmem:[#allocation7 + $0x38] sm:$0xff]  }
  0xf5   : > { %1740 = vmatmul.mubr.bf16.gmra.mrb[52].mxu1 %v3101_v8  ;;  %2848 = vmatprep.subr.bf16.mxu1 %v3149_v7 }
  0xf6   : > { %1747 = vmatprep.mubr.bf16.mxu1 %v3106_v9  ;;  %2849 = vmatpush3.bf16.msra.mxu1 %v3149_v7 }
  0xfb   : > { %1651 = vmatmul.mubr.bf16.gmra.mrb[56].mxu0 %v3104_v10 }
  0xfc   : > { %1658 = vmatprep.mubr.bf16.mxu0 %v3110_v11 }
  0xfd   : > { %1748 = vmatmul.mubr.bf16.gmra.mrb[56].mxu1 %v3109_v12 }
  0xfe   : > { %1755 = vmatprep.mubr.bf16.mxu1 %v3114_v13 }
 0x103   : > { %1659 = vmatmul.mubr.bf16.gmra.mrb[60].mxu0 %v3112_v14 }
 0x104   : > { %1796 = vmatprep.mubr.bf16.mxu0 %v3120_v15 }
 0x105   : > { %1756 = vmatmul.mubr.bf16.gmra.mrb[60].mxu1 %v3117_v16 }
 0x10b   : > { %1797 = vmatmul.mubr.bf16.vlgmr.msra.gmra.mrb[64].mxu0 %v3118_v17 }
 0x10c   : > { %1804 = vmatprep.mubr.bf16.mxu0 %v3121_v18 }
 0x113   : > { %1805 = vmatmul.mubr.bf16.gmra.mrb[68].mxu0 %v3123_v19 }
 0x114   : > { %1812 = vmatprep.mubr.bf16.mxu0 %v3124_v20 }
 0x11b   : > { %1813 = vmatmul.mubr.bf16.gmra.mrb[72].mxu0 %v3126_v21 }
 0x11c   : > { %1820 = vmatprep.mubr.bf16.mxu0 %v3127_v22 }
 0x123   : > { %1821 = vmatmul.mubr.bf16.gmra.mrb[76].mxu0 %v3129_v23 }
 0x124   : > { %1828 = vmatprep.mubr.bf16.mxu0 %v3130_v24 }
 0x12b   : > { %1829 = vmatmul.mubr.bf16.gmra.mrb[80].mxu0 %v3132_v25 }
 0x12c   : > { %1836 = vmatprep.mubr.bf16.mxu0 %v3133_v26 }
 0x133   : > { %1837 = vmatmul.mubr.bf16.gmra.mrb[84].mxu0 %v3135_v27 }
 0x134   : > { %1844 = vmatprep.mubr.bf16.mxu0 %v3136_v28 }
 0x13b   : > { %1845 = vmatmul.mubr.bf16.gmra.mrb[88].mxu0 %v3138_v29 }
 0x13c   : > { %1852 = vmatprep.mubr.bf16.mxu0 %v3139_v30 }
 0x143   : > { %1853 = vmatmul.mubr.bf16.gmra.mrb[92].mxu0 %v3141_v31 }
 0x15e   : > { %v2514_v36 = vpop.f32.mrb[0].mxu0 }
 0x15f   : > { %v2515_v38 = vpop.f32.mrb[1].mxu0 }
 0x160   : > { %v2516_v39 = vadd.f32 %v2515_v38, %v2514_v36  ;;  %v2517_v40 = vpop.f32.mrb[2].mxu0  ;;  %v2578_v41 = vpop.f32.mrb[0].mxu1 }
 0x161   : > { %v2518_v42 = vpop.f32.mrb[3].mxu0  ;;  %v2579_v46 = vpop.f32.mrb[1].mxu1 }
 0x162   : > { %v1411_v44 = vadd.f32 %v2516_v39, %v3612_v37  ;;  %v2519_v45 = vadd.f32 %v2518_v42, %v2517_v40  ;;  %v2580_v47 = vadd.f32 %v2579_v46, %v2578_v41  ;;  %v2581_v48 = vpop.f32.mrb[2].mxu1 }
 0x163   : > { %v2582_v50 = vpop.f32.mrb[3].mxu1 }
 0x164   : > { %v1414_v49 = vadd.f32 %v2519_v45, %v3612_v37  ;;  %v3616_v51 = vadd.f32 %v2580_v47, %v1411_v44  ;;  %v2583_v52 = vadd.f32 %v2582_v50, %v2581_v48 }
 0x166   : > { %v2520_v54 = vpop.f32.mrb[4].mxu0  ;;  %v3618_v55 = vadd.f32 %v2583_v52, %v1414_v49 }
 0x167   : > { %v2521_v56 = vpop.f32.mrb[5].mxu0 }
 0x168   : > { %v2522_v57 = vadd.f32 %v2521_v56, %v2520_v54  ;;  %v2523_v58 = vpop.f32.mrb[6].mxu0  ;;  %v2584_v59 = vpop.f32.mrb[4].mxu1 }
 0x169   : > { %v2524_v60 = vpop.f32.mrb[7].mxu0  ;;  %v2585_v0 = vpop.f32.mrb[5].mxu1 }
 0x16a   : > { %v1419_v62 = vadd.f32 %v2522_v57, %v3612_v37  ;;  %v2525_v63 = vadd.f32 %v2524_v60, %v2523_v58  ;;  %v2586_v1 = vadd.f32 %v2585_v0, %v2584_v59  ;;  %v2587_v2 = vpop.f32.mrb[6].mxu1 }
 0x16b   : > { %v2588_v4 = vpop.f32.mrb[7].mxu1 }
 0x16c   : > { %v1422_v3 = vadd.f32 %v2525_v63, %v3612_v37  ;;  %v3622_v5 = vadd.f32 %v2586_v1, %v1419_v62  ;;  %v2589_v6 = vadd.f32 %v2588_v4, %v2587_v2 }
 0x16e   : > { %v2526_v8 = vpop.f32.mrb[8].mxu0  ;;  %v3624_v9 = vadd.f32 %v2589_v6, %v1422_v3 }
 0x16f   : > { %v2527_v10 = vpop.f32.mrb[9].mxu0 }
 0x170   : > { %v2528_v11 = vadd.f32 %v2527_v10, %v2526_v8  ;;  %v2529_v12 = vpop.f32.mrb[10].mxu0  ;;  %v2590_v13 = vpop.f32.mrb[8].mxu1 }
 0x171   : > { %v2530_v14 = vpop.f32.mrb[11].mxu0  ;;  %v2591_v17 = vpop.f32.mrb[9].mxu1 }
 0x172   : > { %v1427_v15 = vadd.f32 %v2528_v11, %v3612_v37  ;;  %v2531_v16 = vadd.f32 %v2530_v14, %v2529_v12  ;;  %v2592_v18 = vadd.f32 %v2591_v17, %v2590_v13  ;;  %v2593_v19 = vpop.f32.mrb[10].mxu1 }
 0x173   : > { %v2594_v21 = vpop.f32.mrb[11].mxu1 }
 0x174   : > { %v1430_v20 = vadd.f32 %v2531_v16, %v3612_v37  ;;  %v3628_v22 = vadd.f32 %v2592_v18, %v1427_v15  ;;  %v2595_v23 = vadd.f32 %v2594_v21, %v2593_v19 }
 0x176   : > { %v2532_v24 = vpop.f32.mrb[12].mxu0  ;;  %v3630_v25 = vadd.f32 %v2595_v23, %v1430_v20 }
 0x177   : > { %v2533_v26 = vpop.f32.mrb[13].mxu0 }
 0x178   : > { %v2534_v27 = vadd.f32 %v2533_v26, %v2532_v24  ;;  %v2535_v28 = vpop.f32.mrb[14].mxu0  ;;  %v2596_v29 = vpop.f32.mrb[12].mxu1 }
 0x179   : > { %v2536_v30 = vpop.f32.mrb[15].mxu0  ;;  %v2597_v33 = vpop.f32.mrb[13].mxu1 }
 0x17a   : > { %v1435_v31 = vadd.f32 %v2534_v27, %v3612_v37  ;;  %v2537_v32 = vadd.f32 %v2536_v30, %v2535_v28  ;;  %v2598_v34 = vadd.f32 %v2597_v33, %v2596_v29  ;;  %v2599_v35 = vpop.f32.mrb[14].mxu1 }
 0x17b   : > { %v2600_v38 = vpop.f32.mrb[15].mxu1 }
 0x17c   : > { %v1438_v36 = vadd.f32 %v2537_v32, %v3612_v37  ;;  %v3634_v39 = vadd.f32 %v2598_v34, %v1435_v31  ;;  %v2601_v40 = vadd.f32 %v2600_v38, %v2599_v35 }
 0x17e   : > { %v2538_v41 = vpop.f32.mrb[16].mxu0  ;;  %v3636_v42 = vadd.f32 %v2601_v40, %v1438_v36 }
 0x17f   : > { %v2539_v43 = vpop.f32.mrb[17].mxu0 }
 0x180   : > { %v2540_v44 = vadd.f32 %v2539_v43, %v2538_v41  ;;  %v2541_v45 = vpop.f32.mrb[18].mxu0  ;;  %v2602_v46 = vpop.f32.mrb[16].mxu1 }
 0x181   : > { %v2542_v47 = vpop.f32.mrb[19].mxu0  ;;  %v2603_v50 = vpop.f32.mrb[17].mxu1 }
 0x182   : > { %v1443_v48 = vadd.f32 %v2540_v44, %v3612_v37  ;;  %v2543_v49 = vadd.f32 %v2542_v47, %v2541_v45  ;;  %v2604_v52 = vadd.f32 %v2603_v50, %v2602_v46  ;;  %v2605_v53 = vpop.f32.mrb[18].mxu1 }
 0x183   : > { %v2606_v56 = vpop.f32.mrb[19].mxu1 }
 0x184   : > { %v1446_v54 = vadd.f32 %v2543_v49, %v3612_v37  ;;  %v3640_v57 = vadd.f32 %v2604_v52, %v1443_v48  ;;  %v2607_v58 = vadd.f32 %v2606_v56, %v2605_v53 }
 0x186   : > { %v2544_v59 = vpop.f32.mrb[20].mxu0  ;;  %v3642_v60 = vadd.f32 %v2607_v58, %v1446_v54 }
 0x187   : > { %v2545_v61 = vpop.f32.mrb[21].mxu0 }
 0x188   : > { %v2546_v62 = vadd.f32 %v2545_v61, %v2544_v59  ;;  %v2547_v63 = vpop.f32.mrb[22].mxu0  ;;  %v2608_v0 = vpop.f32.mrb[20].mxu1 }
 0x189   : > { %v2548_v1 = vpop.f32.mrb[23].mxu0  ;;  %v2609_v4 = vpop.f32.mrb[21].mxu1 }
 0x18a   : > { %v1451_v2 = vadd.f32 %v2546_v62, %v3612_v37  ;;  %v2549_v3 = vadd.f32 %v2548_v1, %v2547_v63  ;;  %v2610_v6 = vadd.f32 %v2609_v4, %v2608_v0  ;;  %v2611_v7 = vpop.f32.mrb[22].mxu1 }
 0x18b   : > { %v2612_v10 = vpop.f32.mrb[23].mxu1 }
 0x18c   : > { %v1454_v8 = vadd.f32 %v2549_v3, %v3612_v37  ;;  %v3646_v11 = vadd.f32 %v2610_v6, %v1451_v2  ;;  %v2613_v12 = vadd.f32 %v2612_v10, %v2611_v7 }
 0x18e   : > { %v2550_v13 = vpop.f32.mrb[24].mxu0  ;;  %v3648_v14 = vadd.f32 %v2613_v12, %v1454_v8 }
 0x18f   : > { %v2551_v15 = vpop.f32.mrb[25].mxu0 }
 0x190   : > { %v2552_v16 = vadd.f32 %v2551_v15, %v2550_v13  ;;  %v2553_v17 = vpop.f32.mrb[26].mxu0  ;;  %v2614_v18 = vpop.f32.mrb[24].mxu1 }
 0x191   : > { %v2554_v19 = vpop.f32.mrb[27].mxu0  ;;  %v2615_v23 = vpop.f32.mrb[25].mxu1 }
 0x192   : > { %v1459_v20 = vadd.f32 %v2552_v16, %v3612_v37  ;;  %v2555_v21 = vadd.f32 %v2554_v19, %v2553_v17  ;;  %v2616_v24 = vadd.f32 %v2615_v23, %v2614_v18  ;;  %v2617_v26 = vpop.f32.mrb[26].mxu1 }
 0x193   : > { %v2618_v28 = vpop.f32.mrb[27].mxu1 }
 0x194   : > { %v1462_v27 = vadd.f32 %v2555_v21, %v3612_v37  ;;  %v3652_v29 = vadd.f32 %v2616_v24, %v1459_v20  ;;  %v2619_v30 = vadd.f32 %v2618_v28, %v2617_v26 }
 0x196   : > { %v2556_v31 = vpop.f32.mrb[28].mxu0  ;;  %v3654_v32 = vadd.f32 %v2619_v30, %v1462_v27 }
 0x197   : > { %v2557_v33 = vpop.f32.mrb[29].mxu0 }
 0x198   : > { %v2558_v34 = vadd.f32 %v2557_v33, %v2556_v31  ;;  %v2559_v35 = vpop.f32.mrb[30].mxu0  ;;  %v2620_v36 = vpop.f32.mrb[28].mxu1 }
 0x199   : > { %v2560_v38 = vpop.f32.mrb[31].mxu0  ;;  %v2621_v43 = vpop.f32.mrb[29].mxu1 }
 0x19a   : > { %v1467_v40 = vadd.f32 %v2558_v34, %v3612_v37  ;;  %v2561_v41 = vadd.f32 %v2560_v38, %v2559_v35  ;;  %v2622_v44 = vadd.f32 %v2621_v43, %v2620_v36  ;;  %v2623_v45 = vpop.f32.mrb[30].mxu1 }
 0x19b   : > { %v2624_v47 = vpop.f32.mrb[31].mxu1 }
 0x19c   : > { %v1470_v46 = vadd.f32 %v2561_v41, %v3612_v37  ;;  %v3658_v48 = vadd.f32 %v2622_v44, %v1467_v40  ;;  %v2625_v49 = vadd.f32 %v2624_v47, %v2623_v45 }
 0x19e   : > { %v2642_v50 = vpop.f32.mrb[32].mxu0  ;;  %v3660_v52 = vadd.f32 %v2625_v49, %v1470_v46 }
 0x19f   : > { %v2643_v53 = vpop.f32.mrb[33].mxu0 }
 0x1a0   : > { %v2644_v54 = vadd.f32 %v2643_v53, %v2642_v50  ;;  %v2645_v56 = vpop.f32.mrb[34].mxu0  ;;  %v2706_v58 = vpop.f32.mrb[32].mxu1 }
 0x1a1   : > { %v2646_v59 = vpop.f32.mrb[35].mxu0  ;;  %v2707_v63 = vpop.f32.mrb[33].mxu1 }
 0x1a2   : > { %v1605_v61 = vadd.f32 %v2644_v54, %v3616_v51  ;;  %v2647_v62 = vadd.f32 %v2646_v59, %v2645_v56  ;;  %v2708_v0 = vadd.f32 %v2707_v63, %v2706_v58  ;;  %v2709_v1 = vpop.f32.mrb[34].mxu1 }
 0x1a3   : > { %v2710_v2 = vpop.f32.mrb[35].mxu1 }
 0x1a4   : > { %v1608_v37 = vadd.f32 %v2647_v62, %v3618_v55  ;;  %v3664_v3 = vadd.f32 %v2708_v0, %v1605_v61  ;;  %v2711_v4 = vadd.f32 %v2710_v2, %v2709_v1 }
 0x1a6   : > { %v2648_v6 = vpop.f32.mrb[36].mxu0  ;;  %v3666_v7 = vadd.f32 %v2711_v4, %v1608_v37 }
 0x1a7   : > { %v2649_v8 = vpop.f32.mrb[37].mxu0 }
 0x1a8   : > { %v2650_v10 = vadd.f32 %v2649_v8, %v2648_v6  ;;  %v2651_v12 = vpop.f32.mrb[38].mxu0  ;;  %v2712_v13 = vpop.f32.mrb[36].mxu1 }
 0x1a9   : > { %v2652_v15 = vpop.f32.mrb[39].mxu0  ;;  %v2713_v17 = vpop.f32.mrb[37].mxu1 }
 0x1aa   : > { %v1613_v51 = vadd.f32 %v2650_v10, %v3622_v5  ;;  %v2653_v16 = vadd.f32 %v2652_v15, %v2651_v12  ;;  %v2714_v18 = vadd.f32 %v2713_v17, %v2712_v13  ;;  %v2715_v19 = vpop.f32.mrb[38].mxu1 }
 0x1ab   : > { %v2716_v20 = vpop.f32.mrb[39].mxu1 }
 0x1ac   : > { %v1616_v55 = vadd.f32 %v2653_v16, %v3624_v9  ;;  %v3670_v21 = vadd.f32 %v2714_v18, %v1613_v51  ;;  %v2717_v23 = vadd.f32 %v2716_v20, %v2715_v19 }
 0x1ae   : > { %v2654_v24 = vpop.f32.mrb[40].mxu0  ;;  %v3672_v26 = vadd.f32 %v2717_v23, %v1616_v55 }
 0x1af   : > { %v2655_v27 = vpop.f32.mrb[41].mxu0 }
 0x1b0   : > { %v2656_v28 = vadd.f32 %v2655_v27, %v2654_v24  ;;  %v2657_v30 = vpop.f32.mrb[42].mxu0  ;;  %v2718_v31 = vpop.f32.mrb[40].mxu1 }
 0x1b1   : > { %v2658_v33 = vpop.f32.mrb[43].mxu0  ;;  %v2719_v35 = vpop.f32.mrb[41].mxu1 }
 0x1b2   : > { %v1621_v5 = vadd.f32 %v2656_v28, %v3628_v22  ;;  %v2659_v34 = vadd.f32 %v2658_v33, %v2657_v30  ;;  %v2720_v36 = vadd.f32 %v2719_v35, %v2718_v31  ;;  %v2721_v38 = vpop.f32.mrb[42].mxu1 }
 0x1b3   : > { %v2722_v40 = vpop.f32.mrb[43].mxu1 }
 0x1b4   : > { %v1624_v9 = vadd.f32 %v2659_v34, %v3630_v25  ;;  %v3676_v41 = vadd.f32 %v2720_v36, %v1621_v5  ;;  %v2723_v43 = vadd.f32 %v2722_v40, %v2721_v38 }
 0x1b6   : > { %v2660_v44 = vpop.f32.mrb[44].mxu0  ;;  %v3678_v45 = vadd.f32 %v2723_v43, %v1624_v9 }
 0x1b7   : > { %v2661_v46 = vpop.f32.mrb[45].mxu0 }
 0x1b8   : > { %v2662_v47 = vadd.f32 %v2661_v46, %v2660_v44  ;;  %v2663_v49 = vpop.f32.mrb[46].mxu0  ;;  %v2724_v50 = vpop.f32.mrb[44].mxu1 }
 0x1b9   : > { %v2664_v53 = vpop.f32.mrb[47].mxu0  ;;  %v2725_v56 = vpop.f32.mrb[45].mxu1 }
 0x1ba   : > { %v1629_v22 = vadd.f32 %v2662_v47, %v3634_v39  ;;  %v2665_v54 = vadd.f32 %v2664_v53, %v2663_v49  ;;  %v2726_v58 = vadd.f32 %v2725_v56, %v2724_v50  ;;  %v2727_v59 = vpop.f32.mrb[46].mxu1 }
 0x1bb   : > { %v2728_v61 = vpop.f32.mrb[47].mxu1 }
 0x1bc   : > { %v1632_v25 = vadd.f32 %v2665_v54, %v3636_v42  ;;  %v3682_v62 = vadd.f32 %v2726_v58, %v1629_v22  ;;  %v2729_v63 = vadd.f32 %v2728_v61, %v2727_v59 }
 0x1be   : > { %v2666_v0 = vpop.f32.mrb[48].mxu0  ;;  %v3684_v1 = vadd.f32 %v2729_v63, %v1632_v25 }
 0x1bf   : > { %v2667_v37 = vpop.f32.mrb[49].mxu0 }
 0x1c0   : > { %v2668_v2 = vadd.f32 %v2667_v37, %v2666_v0  ;;  %v2669_v4 = vpop.f32.mrb[50].mxu0  ;;  %v2730_v6 = vpop.f32.mrb[48].mxu1 }
 0x1c1   : > { %v2670_v8 = vpop.f32.mrb[51].mxu0  ;;  %v2731_v12 = vpop.f32.mrb[49].mxu1 }
 0x1c2   : > { %v1637_v39 = vadd.f32 %v2668_v2, %v3640_v57  ;;  %v2671_v10 = vadd.f32 %v2670_v8, %v2669_v4  ;;  %v2732_v13 = vadd.f32 %v2731_v12, %v2730_v6  ;;  %v2733_v15 = vpop.f32.mrb[50].mxu1 }
 0x1c3   : > { %v2734_v51 = vpop.f32.mrb[51].mxu1 }
 0x1c4   : > { %v1640_v42 = vadd.f32 %v2671_v10, %v3642_v60  ;;  %v3688_v16 = vadd.f32 %v2732_v13, %v1637_v39  ;;  %v2735_v17 = vadd.f32 %v2734_v51, %v2733_v15 }
 0x1c6   : > { %v2672_v18 = vpop.f32.mrb[52].mxu0  ;;  %v3690_v19 = vadd.f32 %v2735_v17, %v1640_v42 }
 0x1c7   : > { %v2673_v55 = vpop.f32.mrb[53].mxu0 }
 0x1c8   : > { %v2674_v20 = vadd.f32 %v2673_v55, %v2672_v18  ;;  %v2675_v23 = vpop.f32.mrb[54].mxu0  ;;  %v2736_v24 = vpop.f32.mrb[52].mxu1 }
 0x1c9   : > { %v2676_v27 = vpop.f32.mrb[55].mxu0  ;;  %v2737_v30 = vpop.f32.mrb[53].mxu1 }
 0x1ca   : > { %v1645_v57 = vadd.f32 %v2674_v20, %v3646_v11  ;;  %v2677_v28 = vadd.f32 %v2676_v27, %v2675_v23  ;;  %v2738_v31 = vadd.f32 %v2737_v30, %v2736_v24  ;;  %v2739_v33 = vpop.f32.mrb[54].mxu1 }
 0x1cb   : > { %v2740_v5 = vpop.f32.mrb[55].mxu1 }
 0x1cc   : > { %v1648_v60 = vadd.f32 %v2677_v28, %v3648_v14  ;;  %v3694_v34 = vadd.f32 %v2738_v31, %v1645_v57  ;;  %v2741_v35 = vadd.f32 %v2740_v5, %v2739_v33 }
 0x1ce   : > { %v2678_v36 = vpop.f32.mrb[56].mxu0  ;;  %v3696_v38 = vadd.f32 %v2741_v35, %v1648_v60 }
 0x1cf   : > { %v2679_v9 = vpop.f32.mrb[57].mxu0 }
 0x1d0   : > { %v2680_v40 = vadd.f32 %v2679_v9, %v2678_v36  ;;  %v2681_v43 = vpop.f32.mrb[58].mxu0  ;;  %v2742_v44 = vpop.f32.mrb[56].mxu1 }
 0x1d1   : > { %v2682_v46 = vpop.f32.mrb[59].mxu0  ;;  %v2743_v49 = vpop.f32.mrb[57].mxu1 }
 0x1d2   : > { %v1653_v11 = vadd.f32 %v2680_v40, %v3652_v29  ;;  %v2683_v47 = vadd.f32 %v2682_v46, %v2681_v43  ;;  %v2744_v50 = vadd.f32 %v2743_v49, %v2742_v44  ;;  %v2745_v53 = vpop.f32.mrb[58].mxu1 }
 0x1d3   : > { %v2746_v22 = vpop.f32.mrb[59].mxu1 }
 0x1d4   : > { %v1656_v14 = vadd.f32 %v2683_v47, %v3654_v32  ;;  %v3700_v54 = vadd.f32 %v2744_v50, %v1653_v11  ;;  %v2747_v56 = vadd.f32 %v2746_v22, %v2745_v53 }
 0x1d6   : > { %v2684_v58 = vpop.f32.mrb[60].mxu0  ;;  %v3702_v59 = vadd.f32 %v2747_v56, %v1656_v14 }
 0x1d7   : > { %v2685_v25 = vpop.f32.mrb[61].mxu0 }
 0x1d8   : > { %v2686_v61 = vadd.f32 %v2685_v25, %v2684_v58  ;;  %v2687_v63 = vpop.f32.mrb[62].mxu0  ;;  %v2748_v0 = vpop.f32.mrb[60].mxu1 }
 0x1d9   : > { %v2688_v37 = vpop.f32.mrb[63].mxu0  ;;  %v2749_v4 = vpop.f32.mrb[61].mxu1 }
 0x1da   : > { %v1661_v29 = vadd.f32 %v2686_v61, %v3658_v48  ;;  %v2689_v2 = vadd.f32 %v2688_v37, %v2687_v63  ;;  %v2750_v6 = vadd.f32 %v2749_v4, %v2748_v0  ;;  %v2751_v8 = vpop.f32.mrb[62].mxu1 }
 0x1db   : > { %v2752_v39 = vpop.f32.mrb[63].mxu1 }
 0x1dc   : > { %v1664_v32 = vadd.f32 %v2689_v2, %v3660_v52  ;;  %v3706_v10 = vadd.f32 %v2750_v6, %v1661_v29  ;;  %v2753_v12 = vadd.f32 %v2752_v39, %v2751_v8 }
 0x1de   : > { %v2770_v13 = vpop.f32.mrb[64].mxu0  ;;  %v3708_v15 = vadd.f32 %v2753_v12, %v1664_v32 }
 0x1df   : > { %v2771_v42 = vpop.f32.mrb[65].mxu0 }
 0x1e0   : > { %v2772_v51 = vadd.f32 %v2771_v42, %v2770_v13  ;;  %v2773_v17 = vpop.f32.mrb[66].mxu0 }
 0x1e1   : > { %v2774_v18 = vpop.f32.mrb[67].mxu0 }
 0x1e2   : > { %v1799_v55 = vadd.f32 %v2772_v51, %v3664_v3  ;;  %v2775_v48 = vadd.f32 %v2774_v18, %v2773_v17 }
 0x1e4   : > { %v1802_v20 = vadd.f32 %v2775_v48, %v3666_v7  ;;  %v1861_v23 = vmax.f32 %v1799_v55, 0.0 }
 0x1e6   : > { %v1862_v24 = vmax.f32 %v1802_v20, 0.0  ;;  %v2776_v27 = vpop.f32.mrb[68].mxu0 }
 0x1e7   : > { %v2777_v52 = vpop.f32.mrb[69].mxu0 }
 0x1e8   : > { %v2778_v57 = vadd.f32 %v2777_v52, %v2776_v27  ;;  %v2779_v28 = vpop.f32.mrb[70].mxu0  ;;  %v1877_v30 = vpack.c.bf16 %v1862_v24, %v1861_v23 }
 0x1e9   : > { %v2780_v31 = vpop.f32.mrb[71].mxu0 }
 0x1ea   : > { %v1807_v33 = vadd.f32 %v2778_v57, %v3670_v21  ;;  %v2781_v60 = vadd.f32 %v2780_v31, %v2779_v28  ;;  %2850 = vmatprep.mubr.bf16.mxu1 %v1877_v30 }
 0x1ec   : > { %v1810_v5 = vadd.f32 %v2781_v60, %v3672_v26  ;;  %v1863_v35 = vmax.f32 %v1807_v33, 0.0 }
 0x1ee   : > { %v1864_v36 = vmax.f32 %v1810_v5, 0.0  ;;  %v2782_v3 = vpop.f32.mrb[72].mxu0 }
 0x1ef   : > { %v2783_v9 = vpop.f32.mrb[73].mxu0 }
 0x1f0   : > { %v1878_v40 = vpack.c.bf16 %v1864_v36, %v1863_v35  ;;  %v2784_v7 = vadd.f32 %v2783_v9, %v2782_v3  ;;  %v2785_v43 = vpop.f32.mrb[74].mxu0 }
 0x1f1   : > { %v2786_v44 = vpop.f32.mrb[75].mxu0 }
 0x1f2   : > { %v1815_v46 = vadd.f32 %v2784_v7, %v3676_v41  ;;  %v2787_v11 = vadd.f32 %v2786_v44, %v2785_v43  ;;  %2851 = vmatmul.mubr.bf16.vlgmr.msra.gmra.mrb[64].mxu1 %v1878_v40 }
 0x1f4   : > { %v1818_v47 = vadd.f32 %v2787_v11, %v3678_v45  ;;  %v1865_v49 = vmax.f32 %v1815_v46, 0.0 }
 0x1f6   : > { %v1866_v21 = vmax.f32 %v1818_v47, 0.0  ;;  %v2788_v50 = vpop.f32.mrb[76].mxu0 }
 0x1f7   : > { %v2789_v53 = vpop.f32.mrb[77].mxu0 }
 0x1f8   : > { %v2790_v14 = vadd.f32 %v2789_v53, %v2788_v50  ;;  %v2791_v26 = vpop.f32.mrb[78].mxu0  ;;  %v1879_v22 = vpack.c.bf16 %v1866_v21, %v1865_v49 }
 0x1f9   : > { %v2792_v56 = vpop.f32.mrb[79].mxu0 }
 0x1fa   : > { %v1823_v58 = vadd.f32 %v2790_v14, %v3682_v62  ;;  %v2793_v25 = vadd.f32 %v2792_v56, %v2791_v26  ;;  %2854 = vmatprep.mubr.bf16.mxu1 %v1879_v22 }
 0x1fc   : > { %v1826_v61 = vadd.f32 %v2793_v25, %v3684_v1  ;;  %v1867_v63 = vmax.f32 %v1823_v58, 0.0 }
 0x1fe   : > { %v1868_v41 = vmax.f32 %v1826_v61, 0.0  ;;  %v2794_v0 = vpop.f32.mrb[80].mxu0 }
 0x1ff   : > { %v2795_v37 = vpop.f32.mrb[81].mxu0 }
 0x200   : > { %v2796_v29 = vadd.f32 %v2795_v37, %v2794_v0  ;;  %v2797_v45 = vpop.f32.mrb[82].mxu0  ;;  %v1880_v2 = vpack.c.bf16 %v1868_v41, %v1867_v63 }
 0x201   : > { %v2798_v4 = vpop.f32.mrb[83].mxu0 }
 0x202   : > { %v1831_v6 = vadd.f32 %v2796_v29, %v3688_v16  ;;  %v2799_v8 = vadd.f32 %v2798_v4, %v2797_v45  ;;  %2855 = vmatmul.mubr.bf16.gmra.mrb[68].mxu1 %v1880_v2 }
 0x204   : > { %v1834_v32 = vadd.f32 %v2799_v8, %v3690_v19  ;;  %v1869_v39 = vmax.f32 %v1831_v6, 0.0 }
 0x206   : > { %v1870_v62 = vmax.f32 %v1834_v32, 0.0  ;;  %v2800_v12 = vpop.f32.mrb[84].mxu0 }
 0x207   : > { %v2801_v13 = vpop.f32.mrb[85].mxu0 }
 0x208   : > { %v2802_v42 = vadd.f32 %v2801_v13, %v2800_v12  ;;  %v2803_v1 = vpop.f32.mrb[86].mxu0  ;;  %v1881_v51 = vpack.c.bf16 %v1870_v62, %v1869_v39 }
 0x209   : > { %v2804_v17 = vpop.f32.mrb[87].mxu0 }
 0x20a   : > { %v1839_v18 = vadd.f32 %v2802_v42, %v3694_v34  ;;  %v2805_v55 = vadd.f32 %v2804_v17, %v2803_v1  ;;  %2858 = vmatprep.mubr.bf16.mxu1 %v1881_v51 }
 0x20c   : > { %v1842_v48 = vadd.f32 %v2805_v55, %v3696_v38  ;;  %v1871_v20 = vmax.f32 %v1839_v18, 0.0 }
 0x20e   : > { %v1872_v16 = vmax.f32 %v1842_v48, 0.0  ;;  %v2806_v23 = vpop.f32.mrb[88].mxu0 }
 0x20f   : > { %v2807_v24 = vpop.f32.mrb[89].mxu0 }
 0x210   : > { %v2808_v27 = vadd.f32 %v2807_v24, %v2806_v23  ;;  %v2809_v19 = vpop.f32.mrb[90].mxu0  ;;  %v1882_v52 = vpack.c.bf16 %v1872_v16, %v1871_v20 }
 0x211   : > { %v2810_v57 = vpop.f32.mrb[91].mxu0 }
 0x212   : > { %v1847_v28 = vadd.f32 %v2808_v27, %v3700_v54  ;;  %v2811_v30 = vadd.f32 %v2810_v57, %v2809_v19  ;;  %2859 = vmatmul.mubr.bf16.gmra.mrb[72].mxu1 %v1882_v52 }
 0x214   : > { %v1850_v31 = vadd.f32 %v2811_v30, %v3702_v59  ;;  %v1873_v33 = vmax.f32 %v1847_v28, 0.0 }
 0x216   : > { %v1874_v34 = vmax.f32 %v1850_v31, 0.0  ;;  %v2812_v60 = vpop.f32.mrb[92].mxu0 }
 0x217   : > { %v2813_v5 = vpop.f32.mrb[93].mxu0 }
 0x218   : > { %v2814_v38 = vadd.f32 %v2813_v5, %v2812_v60  ;;  %v2815_v35 = vpop.f32.mrb[94].mxu0  ;;  %v1883_v36 = vpack.c.bf16 %v1874_v34, %v1873_v33 }
 0x219   : > { %v2816_v3 = vpop.f32.mrb[95].mxu0 }
 0x21a   : > { %v1855_v9 = vadd.f32 %v2814_v38, %v3706_v10  ;;  %v2817_v40 = vadd.f32 %v2816_v3, %v2815_v35  ;;  %2862 = vmatprep.mubr.bf16.mxu1 %v1883_v36 }
 0x21c   : > { %v1858_v7 = vadd.f32 %v2817_v40, %v3708_v15  ;;  %v1875_v54 = vmax.f32 %v1855_v9, 0.0 }
 0x21e   : > { %v1876_v43 = vmax.f32 %v1858_v7, 0.0 }
 0x220   : > { %v1884_v44 = vpack.c.bf16 %v1876_v43, %v1875_v54 }
 0x222   : > { %2863 = vmatmul.mubr.bf16.gmra.mrb[76].mxu1 %v1884_v44 }
 0x2c5   : > { %v2852_v59 = vpop.f32.mrb[64].mxu1 }
 0x2c6   : > { %v1983_v46 = vpop.f32.mrb[65].mxu1 }
 0x2c7   : > { %v2853_v11 = vpop.f32.mrb[66].mxu1 }
 0x2c8   : > { %v2459_v47 = vpack.c.bf16 %v2853_v11, %v2852_v59  ;;  %v1986_v49 = vpop.f32.mrb[67].mxu1 }
 0x2c9   : > { %v2454_v21 = vpack.c.bf16 %v1986_v49, %v1983_v46 }
 0x2ca   : > { %2491 = vst [vmem:[%s245_s29 + $0x8] sm:$0xff] %v2459_v47  }
 0x2cb   : > { %2455 = vst [vmem:[%s245_s29] sm:$0xff] %v2454_v21  }
 0x2d5   : > { %v2856_v50 = vpop.f32.mrb[68].mxu1 }
 0x2d6   : > { %v1999_v10 = vpop.f32.mrb[69].mxu1 }
 0x2d7   : > { %v2857_v53 = vpop.f32.mrb[70].mxu1 }
 0x2d8   : > { %v2469_v14 = vpack.c.bf16 %v2857_v53, %v2856_v50  ;;  %v2002_v15 = vpop.f32.mrb[71].mxu1 }
 0x2d9   : > { %v2464_v26 = vpack.c.bf16 %v2002_v15, %v1999_v10 }
 0x2da   : > { %2493 = vst [vmem:[%s245_s29 + $0x18] sm:$0xff] %v2469_v14  }
 0x2db   : > { %2492 = vst [vmem:[%s245_s29 + $0x10] sm:$0xff] %v2464_v26  }
 0x2e5   : > { %v2860_v22 = vpop.f32.mrb[72].mxu1 }
 0x2e6   : > { %v2015_v56 = vpop.f32.mrb[73].mxu1 }
 0x2e7   : > { %v2861_v58 = vpop.f32.mrb[74].mxu1 }
 0x2e8   : > { %v2479_v25 = vpack.c.bf16 %v2861_v58, %v2860_v22  ;;  %v2018_v61 = vpop.f32.mrb[75].mxu1 }
 0x2e9   : > { %v2474_v63 = vpack.c.bf16 %v2018_v61, %v2015_v56 }
 0x2ea   : > { %2495 = vst [vmem:[%s245_s29 + $0x28] sm:$0xff] %v2479_v25  }
 0x2eb   : > { %2494 = vst [vmem:[%s245_s29 + $0x20] sm:$0xff] %v2474_v63  }
 0x2f5   : > { %v2864_v41 = vpop.f32.mrb[76].mxu1 }
 0x2f6   : > { %v2031_v0 = vpop.f32.mrb[77].mxu1 }
 0x2f7   : > { %v2865_v37 = vpop.f32.mrb[78].mxu1 }
 0x2f8   : > { %v2489_v29 = vpack.c.bf16 %v2865_v37, %v2864_v41  ;;  %v2034_v45 = vpop.f32.mrb[79].mxu1 }
 0x2f9   : > { %v2484_v2 = vpack.c.bf16 %v2034_v45, %v2031_v0 }
 0x2fa   : > { %2497 = vst [vmem:[%s245_s29 + $0x38] sm:$0xff] %v2489_v29  }
 0x2fb   : > { %2496 = vst [vmem:[%s245_s29 + $0x30] sm:$0xff] %v2484_v2  }
 0x2fc   : > { %3249 = shalt.err (!%p3246_p2)
}
 0x2fd   : > { %s3250_s8 = scalar_lea.hbm %s3733_s24, 1024  ;;  %s3254_s21 = scalar_lea.hbm %s3781_s4, 2048 }
 0x2fe   : > { %p3251_p13 = scmp.ne.s32.totalorder %s3733_s24, %s3250_s8  ;;  %p3255_p4 = scmp.lt.u32.totalorder %s3733_s24, %s3781_s4 }
 0x2ff   : > { %p3256_p5 = scmp.lt.u32.totalorder %s3254_s21, %s3250_s8  ;;  %p3258_p11 = scmp.lt.u32.totalorder %s3250_s8, %s3733_s24 }
 0x300   : > { %p3252_p6 = pnand %p3251_p13, %p3795_p0 }
 0x301   : > { %p3257_p8 = por %p3256_p5, %p3255_p4 }
 0x302   : > { %p3253_p10 = pneg %p3252_p6 }
 0x303   : > { %p3259_p1 = por %p3258_p11, %p3257_p8 }
 0x305   : > { %p3260_p3 = pnand %p3259_p1, %p3253_p10 }
 0x307   : > { %3263 = shalt.err (!%p3260_p3)
}
 0x308   : > { %s3316_s29 = smov 64   ;;  %s3317_s6 = smov 4  }
 0x309   : > { %2879 = dma.vmem_to_hbm [thread:$0]  (%p3795_p0), %s3728_s5, 1024, %s3733_s24, %s2127_s12, %s3316_s29, %s3316_s29, %s3317_s6  }
 0x30a PF: > { %s2155_s28 = sand.u32 1, %s3294_s15   ;;  %p3796_p7 = scmp.ne.s32.totalorder %s3786_s22, 0 }
 0x30b   : > { %p3797_p9 = scmp.ge.s32.totalorder %s3306_s18, 2  ;;  %s2156_s20 = scalar_lea.sflag [#allocation4], %s2155_s28 }
 0x30d   : > { %p2893_p12 = pnand %p3797_p9, %p3796_p7 }
 0x30f   : > { %3289 = dma.done.wait (!%p2893_p12), %s2156_s20, 1024  }
 0x310   : > { %3291 = vsyncadd (!%p2893_p12), %s2156_s20, 4294966272  ;;  %p18_p2 = scmp.ge.s32.totalorder %s3453_s9, 4   ;;  %s3798_s15 = smov %s3298_s16 }
 0x311   : > { %s3799_s16 = smov %s3302_s17  ;;  %s3800_s17 = smov %s3469_s14 }
 0x312   : > { %s3801_s18 = smov %s3453_s9  ;;  %20 = sbr.rel (!%p18_p2) target bundleno = 6 (0x6), region = 89 }
 0x319   :  { %2161 = vsyncpa [#allocation3], 1 }
 0x31a   :  { %2163 = vsyncpa [#allocation3 + $0x1], 1 }
 0x31b   :  { %2164 = vsyncpa [#allocation6], 1 }
 0x31c   :  { %2165 = vsyncpa [#allocation4], 1 }
 0x31d   :  { %2167 = vsyncpa [#allocation4 + $0x1], 1 }

</bundles_post_ra>
